<compile_context>
chip_gen: v7x
topology: tpu7x:2x2x1
jax: 0.10.0
libtpu: 0.0.40
codegen_flags: <defaults>
</compile_context>

<pallas_src>
import functools
import math

import jax
import jax.numpy as jnp
from jax.experimental import pallas as pl
from jax.experimental.pallas import tpu as pltpu


# ----------------------------------------------------------------------------
# Fused ResidualGroup kernel (one grid step == one image, whole group)
# ----------------------------------------------------------------------------

def _residual_group_kernel(x_ref, w1_ref, b1_ref, w2_ref, b2_ref,
                           cw1_ref, cb1_ref, cw2_ref, cb2_ref,
                           wf_ref, bf_ref,
                           o_ref,
                           ext_ref, res_ref,
                           *, H, W, C, n_blocks, pad):
    HW = H * W

    # x-boundary masks for the 3x3 taps (the y-boundary is handled for free by
    # the zero end padding of ext_ref).  Hoisted out of all loops.
    col = jax.lax.broadcasted_iota(jnp.int32, (1, HW), 1) % W
    left_mask = (col != 0).astype(jnp.float32)        # taps with dx == 0
    right_mask = (col != W - 1).astype(jnp.float32)   # taps with dx == 2

    # Zero the shifted-tap staging buffer ONCE per image.  Only the end pads
    # must stay zero; the interior window is fully rewritten before every conv.
    ext_ref[...] = jnp.zeros_like(ext_ref)

    def conv3x3(v, w_ref, b_ref, blk, relu):
        """3x3 same conv, channels-first.  v: (C, H*W) f32 -> (C, H*W) f32.

        Nine accumulated (C,C)@(C,HW) matmuls on bf16 operands (f32 accum) over
        shifted views of the staging buffer.  No im2col materialization.
        """
        if blk is None:
            w_all = w_ref[...]            # (9, C, C) bf16
            bias = b_ref[...]             # (C, 1)  f32
        else:
            w_all = w_ref[blk]            # dynamic leading index (fori_loop)
            bias = b_ref[blk]

        # Stage the conv input.  `pad` is a multiple of 128 and the width is
        # H*W, so this store is lane-aligned (no masked vst).
        ext_ref[:, pad:pad + HW] = v

        accs = [None, None, None]         # grouped by dx for x-boundary masking
        for dy in range(3):
            for dx in range(3):
                s = (dy - 1) * W + (dx - 1)
                xs = ext_ref[:, pad + s:pad + s + HW].astype(jnp.bfloat16)
                contrib = jnp.dot(w_all[3 * dy + dx], xs,
                                  preferred_element_type=jnp.float32)
                accs[dx] = contrib if accs[dx] is None else accs[dx] + contrib

        out = accs[1] + accs[0] * left_mask + accs[2] * right_mask + bias
        if relu:
            out = jnp.maximum(out, 0.0)
        return out

    # Running residual stays in VMEM scratch (f32) for the whole group.
    res_ref[...] = x_ref[0].astype(jnp.float32)       # (C, HW)

    def rcab(blk, carry):
        t = conv3x3(res_ref[...], w1_ref, b1_ref, blk, relu=True)
        r = conv3x3(t, w2_ref, b2_ref, blk, relu=False)
        # Channel attention (f32): GAP -> 1x1 -> ReLU -> 1x1 -> sigmoid.
        y = jnp.sum(r, axis=1, keepdims=True) * (1.0 / HW)               # (C, 1)
        h = jnp.maximum(
            jnp.dot(cw1_ref[blk], y, preferred_element_type=jnp.float32)
            + cb1_ref[blk], 0.0)                                         # (Cr, 1)
        s = jax.nn.sigmoid(
            jnp.dot(cw2_ref[blk], h, preferred_element_type=jnp.float32)
            + cb2_ref[blk])                                              # (C, 1)
        res_ref[...] = r * s + res_ref[...]                              # RCAB skip
        return carry

    jax.lax.fori_loop(0, n_blocks, rcab, 0)

    # Tail conv + group residual fused into the single lane-dense output store.
    out = conv3x3(res_ref[...], wf_ref, bf_ref, None, relu=False)
    out = out + x_ref[0].astype(jnp.float32)
    o_ref[0] = out.astype(o_ref.dtype)


# ----------------------------------------------------------------------------
# Wrapper
# ----------------------------------------------------------------------------

def pack_group_params(params, mxu_dtype=jnp.bfloat16):
    """Stack per-block weights.  Conv weights are PyTorch OIHW (Cout,Cin,3,3)
    and are repacked to (9, Cout, Cin) per-tap left-multiply matrices."""
    blocks = params["blocks"]
    nb = len(blocks)
    C = params["wf"].shape[0]

    def taps(w):                                  # (Cout, Cin, 3, 3) -> (9, Cout, Cin)
        return jnp.transpose(w, (2, 3, 0, 1)).reshape(9, w.shape[0], w.shape[1])

    return {
        "w1": jnp.stack([taps(b["w1"]) for b in blocks]).astype(mxu_dtype),
        "b1": jnp.stack([b["b1"] for b in blocks]).reshape(nb, C, 1),
        "w2": jnp.stack([taps(b["w2"]) for b in blocks]).astype(mxu_dtype),
        "b2": jnp.stack([b["b2"] for b in blocks]).reshape(nb, C, 1),
        "cw1": jnp.stack([b["ca_w1"] for b in blocks]),                  # (nb, Cr, C)
        "cb1": jnp.stack([b["ca_b1"] for b in blocks])[..., None],       # (nb, Cr, 1)
        "cw2": jnp.stack([b["ca_w2"] for b in blocks]),                  # (nb, C, Cr)
        "cb2": jnp.stack([b["ca_b2"] for b in blocks]).reshape(nb, C, 1),
        "wf": taps(params["wf"]).astype(mxu_dtype),                      # (9, C, C)
        "bf": params["bf"].reshape(C, 1),
    }


def _vmem_budget_bytes(C, HW, next_, nb, cr):
    f32, bf16 = 4, 2
    io_blocks = 2 * 2 * C * HW * f32                        # x + out, double-buffered
    conv_w = (2 * nb + 1) * 9 * C * C * bf16
    small = ((2 * nb + 1) * C + nb * (cr * C + cr + C * cr + C)) * f32
    weights = 2 * (conv_w + small)                           # default double buffering
    scratch = C * next_ * f32 + C * HW * f32
    return io_blocks + weights + scratch


def residual_group_forward_nchw(x_nchw, params):
    """PyTorch-compatible entry point: x in NCHW (f32)."""
    packed = pack_group_params(params)
    B, C, H, W = x_nchw.shape
    HW = H * W
    nb = packed["w1"].shape[0]
    cr = packed["cw1"].shape[1]
    pad = ((W + 1 + 127) // 128) * 128          # aligned staging offset, >= W+1
    next_ = HW + 2 * pad

    vmem_limit = int(min(64 * 2 ** 20,
                         max(16 * 2 ** 20,
                             2 * _vmem_budget_bytes(C, HW, next_, nb, cr))))

    kernel = functools.partial(_residual_group_kernel, H=H, W=W, C=C,
                               n_blocks=nb, pad=pad)
    x = x_nchw.reshape(B, C, HW)                # free reshape; lane-dense last dim

    out = pl.pallas_call(
        kernel,
        out_shape=jax.ShapeDtypeStruct((B, C, HW), x.dtype),
        grid=(B,),
        in_specs=[
            pl.BlockSpec((1, C, HW), lambda i: (i, 0, 0)),        # x
            pl.BlockSpec((nb, 9, C, C), lambda i: (0, 0, 0, 0)),  # w1 taps (bf16)
            pl.BlockSpec((nb, C, 1), lambda i: (0, 0, 0)),        # b1
            pl.BlockSpec((nb, 9, C, C), lambda i: (0, 0, 0, 0)),  # w2 taps (bf16)
            pl.BlockSpec((nb, C, 1), lambda i: (0, 0, 0)),        # b2
            pl.BlockSpec((nb, cr, C), lambda i: (0, 0, 0)),       # ca_w1
            pl.BlockSpec((nb, cr, 1), lambda i: (0, 0, 0)),       # ca_b1
            pl.BlockSpec((nb, C, cr), lambda i: (0, 0, 0)),       # ca_w2
            pl.BlockSpec((nb, C, 1), lambda i: (0, 0, 0)),        # ca_b2
            pl.BlockSpec((9, C, C), lambda i: (0, 0, 0)),         # tail conv taps
            pl.BlockSpec((C, 1), lambda i: (0, 0)),               # tail conv bias
        ],
        out_specs=pl.BlockSpec((1, C, HW), lambda i: (i, 0, 0)),
        scratch_shapes=[
            pltpu.VMEM((C, next_), jnp.float32),   # shifted-tap staging (zero pads)
            pltpu.VMEM((C, HW), jnp.float32),      # running residual
        ],
        compiler_params=pltpu.CompilerParams(
            dimension_semantics=("parallel",),
            vmem_limit_bytes=vmem_limit),
    )(x, packed["w1"], packed["b1"], packed["w2"], packed["b2"],
      packed["cw1"], packed["cb1"], packed["cw2"], packed["cb2"],
      packed["wf"], packed["bf"])
    return out.reshape(B, C, H, W)


# ----------------------------------------------------------------------------
# Pure-JAX reference (ground truth, f32, PyTorch OIHW semantics)
# ----------------------------------------------------------------------------

def _ref_conv(x, w, b):
    y = jax.lax.conv_general_dilated(
        x, w, window_strides=(1, 1), padding="SAME",
        dimension_numbers=("NCHW", "OIHW", "NCHW"))
    return y + b.reshape(1, -1, 1, 1)


def ref_forward_nchw(x, params):
    res = x
    for blk in params["blocks"]:
        r = jax.nn.relu(_ref_conv(res, blk["w1"], blk["b1"]))
        r = _ref_conv(r, blk["w2"], blk["b2"])
        y = jnp.mean(r, axis=(2, 3), keepdims=True)                       # (B,C,1,1)
        h = jax.nn.relu(jnp.einsum("oc,bcij->boij", blk["ca_w1"], y)
                        + blk["ca_b1"].reshape(1, -1, 1, 1))
        s = jax.nn.sigmoid(jnp.einsum("co,boij->bcij", blk["ca_w2"], h)
                           + blk["ca_b2"].reshape(1, -1, 1, 1))
        res = r * s + res
    res = _ref_conv(res, params["wf"], params["bf"])
    return res + x


# ----------------------------------------------------------------------------
# Deterministic parameter init (synthetic; PyTorch OIHW layout)
# ----------------------------------------------------------------------------

def init_params(key, n_feat, reduction, n_resblocks):
    cr = n_feat // reduction
    conv_scale = 1.0 / math.sqrt(9.0 * n_feat)
    blocks = []
    for _ in range(n_resblocks):
        key, *ks = jax.random.split(key, 9)
        blocks.append({
            "w1": jax.random.normal(ks[0], (n_feat, n_feat, 3, 3), jnp.float32) * conv_scale,
            "b1": jax.random.normal(ks[1], (n_feat,), jnp.float32) * 0.01,
            "w2": jax.random.normal(ks[2], (n_feat, n_feat, 3, 3), jnp.float32) * conv_scale,
            "b2": jax.random.normal(ks[3], (n_feat,), jnp.float32) * 0.01,
            "ca_w1": jax.random.normal(ks[4], (cr, n_feat), jnp.float32) / math.sqrt(n_feat),
            "ca_b1": jax.random.normal(ks[5], (cr,), jnp.float32) * 0.01,
            "ca_w2": jax.random.normal(ks[6], (n_feat, cr), jnp.float32) / math.sqrt(cr),
            "ca_b2": jax.random.normal(ks[7], (n_feat,), jnp.float32) * 0.01,
        })
    key, k1, k2 = jax.random.split(key, 3)
    return {
        "blocks": blocks,
        "wf": jax.random.normal(k1, (n_feat, n_feat, 3, 3), jnp.float32) * conv_scale,
        "bf": jax.random.normal(k2, (n_feat,), jnp.float32) * 0.01,
    }


if __name__ == "__main__":
    # Shapes consistent with ResidualGroup(conv, n_feat=16, kernel_size=3,
    # reduction=4, act=ReLU, res_scale=1, n_resblocks=2)
    B, C, H, W = 2, 16, 16, 16
    reduction, n_resblocks = 4, 2

    key = jax.random.PRNGKey(0)
    key, kx = jax.random.split(key)
    x = jax.random.normal(kx, (B, C, H, W), jnp.float32)   # NCHW, like PyTorch
    params = init_params(key, C, reduction, n_resblocks)

    out = jax.block_until_ready(residual_group_forward_nchw(x, params))
    ref = jax.block_until_ready(ref_forward_nchw(x, params))

    assert out.shape == (B, C, H, W)
    max_err = float(jnp.max(jnp.abs(out - ref)))
    # bf16 MXU operands (f32 accumulation) vs. an all-f32 reference.
    assert jnp.allclose(out, ref, rtol=3e-2, atol=3e-2), f"max abs err {max_err}"

    print("KERNEL_OK")
</pallas_src>

<mosaic_0001>
module attributes {stable_mosaic.version = 11 : i64} {
  func.func @_residual_group_kernel(%arg0: i32, %arg1: memref<1x16x256xf32, #tpu.memory_space<vmem>>, %arg2: memref<2x9x16x16xbf16, #tpu.memory_space<vmem>>, %arg3: memref<2x16x1xf32, #tpu.memory_space<vmem>>, %arg4: memref<2x9x16x16xbf16, #tpu.memory_space<vmem>>, %arg5: memref<2x16x1xf32, #tpu.memory_space<vmem>>, %arg6: memref<2x4x16xf32, #tpu.memory_space<vmem>>, %arg7: memref<2x4x1xf32, #tpu.memory_space<vmem>>, %arg8: memref<2x16x4xf32, #tpu.memory_space<vmem>>, %arg9: memref<2x16x1xf32, #tpu.memory_space<vmem>>, %arg10: memref<9x16x16xbf16, #tpu.memory_space<vmem>>, %arg11: memref<16x1xf32, #tpu.memory_space<vmem>>, %arg12: memref<1x16x256xf32, #tpu.memory_space<vmem>>, %arg13: memref<16x512xf32, #tpu.memory_space<vmem>>, %arg14: memref<16x256xf32, #tpu.memory_space<vmem>>) attributes {dimension_semantics = [#tpu.dimension_semantics<parallel>], iteration_bounds = array<i64: 2>, scalar_prefetch = 0 : i64, scratch_operands = 2 : i64, tpu.core_type = #tpu.core_type<tc>, window_params = [{transform_indices = @transform_0, window_bounds = array<i64: 1, 16, 256>}, {pipeline_mode = #tpu.pipeline_mode<synchronous>, transform_indices = @transform_1, window_bounds = array<i64: 2, 9, 16, 16>}, {pipeline_mode = #tpu.pipeline_mode<synchronous>, transform_indices = @transform_2, window_bounds = array<i64: 2, 16, 1>}, {pipeline_mode = #tpu.pipeline_mode<synchronous>, transform_indices = @transform_3, window_bounds = array<i64: 2, 9, 16, 16>}, {pipeline_mode = #tpu.pipeline_mode<synchronous>, transform_indices = @transform_4, window_bounds = array<i64: 2, 16, 1>}, {pipeline_mode = #tpu.pipeline_mode<synchronous>, transform_indices = @transform_5, window_bounds = array<i64: 2, 4, 16>}, {pipeline_mode = #tpu.pipeline_mode<synchronous>, transform_indices = @transform_6, window_bounds = array<i64: 2, 4, 1>}, {pipeline_mode = #tpu.pipeline_mode<synchronous>, transform_indices = @transform_7, window_bounds = array<i64: 2, 16, 4>}, {pipeline_mode = #tpu.pipeline_mode<synchronous>, transform_indices = @transform_8, window_bounds = array<i64: 2, 16, 1>}, {pipeline_mode = #tpu.pipeline_mode<synchronous>, transform_indices = @transform_9, window_bounds = array<i64: 9, 16, 16>}, {pipeline_mode = #tpu.pipeline_mode<synchronous>, transform_indices = @transform_10, window_bounds = array<i64: 16, 1>}, {transform_indices = @transform_11, window_bounds = array<i64: 1, 16, 256>}]} {
    %0 = tpu.iota {dimensions = array<i32: 1>} : vector<1x256xi32>
    %c16_i32 = arith.constant 16 : i32
    %c0_i32 = arith.constant 0 : i32
    %1 = arith.cmpi eq, %c16_i32, %c0_i32 : i32
    %c1_i32 = arith.constant 1 : i32
    %2 = arith.select %1, %c1_i32, %c16_i32 : i32
    %3 = vector.broadcast %2 : i32 to vector<1x256xi32>
    %4 = arith.remsi %0, %3 : vector<1x256xi32>
    %c0_i32_0 = arith.constant 0 : i32
    %5 = vector.broadcast %c0_i32_0 : i32 to vector<1x256xi32>
    %6 = arith.cmpi ne, %4, %5 : vector<1x256xi32>
    %c0_i32_1 = arith.constant 0 : i32
    %7 = vector.broadcast %c0_i32_1 : i32 to vector<1x256xi32>
    %8 = arith.cmpi slt, %4, %7 : vector<1x256xi32>
    %c0_i32_2 = arith.constant 0 : i32
    %9 = arith.cmpi slt, %2, %c0_i32_2 : i32
    %10 = vector.broadcast %9 : i1 to vector<1x256xi1>
    %11 = vector.broadcast %10 : vector<1x256xi1> to vector<1x256xi1>
    %12 = arith.xori %8, %11 : vector<1x256xi1>
    %13 = arith.andi %12, %6 : vector<1x256xi1>
    %14 = vector.broadcast %2 : i32 to vector<1x256xi32>
    %15 = arith.addi %4, %14 : vector<1x256xi32>
    %16 = arith.select %13, %15, %4 : vector<1x256xi1>, vector<1x256xi32>
    %c0_i32_3 = arith.constant 0 : i32
    %17 = vector.broadcast %c0_i32_3 : i32 to vector<1x256xi32>
    %18 = arith.cmpi ne, %16, %17 : vector<1x256xi32>
    %19 = arith.extui %18 : vector<1x256xi1> to vector<1x256xi32>
    %20 = arith.sitofp %19 : vector<1x256xi32> to vector<1x256xf32>
    %c15_i32 = arith.constant 15 : i32
    %21 = vector.broadcast %c15_i32 : i32 to vector<1x256xi32>
    %22 = arith.cmpi ne, %16, %21 : vector<1x256xi32>
    %23 = arith.extui %22 : vector<1x256xi1> to vector<1x256xi32>
    %24 = arith.sitofp %23 : vector<1x256xi32> to vector<1x256xf32>
    %cst = arith.constant 0.000000e+00 : f32
    %25 = vector.broadcast %cst : f32 to vector<16x512xf32>
    %c0 = arith.constant 0 : index
    %c0_4 = arith.constant 0 : index
    %26 = vector.load %arg13[%c0, %c0_4] : memref<16x512xf32, #tpu.memory_space<vmem>>, vector<16x512xf32>
    tpu.vector_store %arg13[%c0, %c0_4], %25 {strides = array<i32>} : memref<16x512xf32, #tpu.memory_space<vmem>>, vector<16x512xf32>,
    %c0_5 = arith.constant 0 : index
    %c0_6 = arith.constant 0 : index
    %c0_7 = arith.constant 0 : index
    %27 = vector.load %arg1[%c0_5, %c0_6, %c0_7] : memref<1x16x256xf32, #tpu.memory_space<vmem>>, vector<1x16x256xf32>
    %28 = vector.shape_cast %27 : vector<1x16x256xf32> to vector<16x256xf32>
    %c0_8 = arith.constant 0 : index
    %c0_9 = arith.constant 0 : index
    %29 = vector.load %arg14[%c0_8, %c0_9] : memref<16x256xf32, #tpu.memory_space<vmem>>, vector<16x256xf32>
    tpu.vector_store %arg14[%c0_8, %c0_9], %28 {strides = array<i32>} : memref<16x256xf32, #tpu.memory_space<vmem>>, vector<16x256xf32>,
    %c0_i32_10 = arith.constant 0 : i32
    %c2_i32 = arith.constant 2 : i32
    %30 = arith.addi %c0_i32_10, %c2_i32 : i32
    %c1_i32_11 = arith.constant 1 : i32
    scf.for %arg15 = %c0_i32_10 to %30 step %c1_i32_11  : i32 {
      %c0_46 = arith.constant 0 : index
      %c0_47 = arith.constant 0 : index
      %100 = vector.load %arg14[%c0_46, %c0_47] : memref<16x256xf32, #tpu.memory_space<vmem>>, vector<16x256xf32>
      %101 = arith.index_cast %arg15 : i32 to index
      %c0_48 = arith.constant 0 : index
      %c0_49 = arith.constant 0 : index
      %c0_50 = arith.constant 0 : index
      %102 = vector.load %arg2[%101, %c0_48, %c0_49, %c0_50] : memref<2x9x16x16xbf16, #tpu.memory_space<vmem>>, vector<1x9x16x16xbf16>
      %103 = vector.shape_cast %102 : vector<1x9x16x16xbf16> to vector<9x16x16xbf16>
      %104 = arith.index_cast %arg15 : i32 to index
      %c0_51 = arith.constant 0 : index
      %c0_52 = arith.constant 0 : index
      %105 = vector.load %arg3[%104, %c0_51, %c0_52] : memref<2x16x1xf32, #tpu.memory_space<vmem>>, vector<1x16x1xf32>
      %106 = vector.shape_cast %105 : vector<1x16x1xf32> to vector<16x1xf32>
      %c0_53 = arith.constant 0 : index
      %c128_54 = arith.constant 128 : index
      %107 = vector.load %arg13[%c0_53, %c128_54] : memref<16x512xf32, #tpu.memory_space<vmem>>, vector<16x256xf32>
      tpu.vector_store %arg13[%c0_53, %c128_54], %100 {strides = array<i32>} : memref<16x512xf32, #tpu.memory_space<vmem>>, vector<16x256xf32>,
      %c0_55 = arith.constant 0 : index
      %c111_56 = arith.constant 111 : index
      %108 = vector.load %arg13[%c0_55, %c111_56] : memref<16x512xf32, #tpu.memory_space<vmem>>, vector<16x256xf32>
      %109 = arith.truncf %108 : vector<16x256xf32> to vector<16x256xbf16>
      %110 = vector.extract_strided_slice %103 {offsets = [0, 0, 0], sizes = [1, 16, 16], strides = [1, 1, 1]} : vector<9x16x16xbf16> to vector<1x16x16xbf16>
      %111 = vector.shape_cast %110 : vector<1x16x16xbf16> to vector<16x16xbf16>
      %cst_57 = arith.constant dense<0.000000e+00> : vector<16x256xf32>
      %112 = tpu.matmul %111, %109, %cst_57 {dimension_numbers = #tpu.dot_dimension_numbers<[1], [0], [0], [1], [0, 0, 1, 1], [], []>} : vector<16x16xbf16>, vector<16x256xbf16>, vector<16x256xf32> -> vector<16x256xf32>
      %c0_58 = arith.constant 0 : index
      %c112_59 = arith.constant 112 : index
      %113 = vector.load %arg13[%c0_58, %c112_59] : memref<16x512xf32, #tpu.memory_space<vmem>>, vector<16x256xf32>
      %114 = arith.truncf %113 : vector<16x256xf32> to vector<16x256xbf16>
      %115 = vector.extract_strided_slice %103 {offsets = [1, 0, 0], sizes = [1, 16, 16], strides = [1, 1, 1]} : vector<9x16x16xbf16> to vector<1x16x16xbf16>
      %116 = vector.shape_cast %115 : vector<1x16x16xbf16> to vector<16x16xbf16>
      %cst_60 = arith.constant dense<0.000000e+00> : vector<16x256xf32>
      %117 = tpu.matmul %116, %114, %cst_60 {dimension_numbers = #tpu.dot_dimension_numbers<[1], [0], [0], [1], [0, 0, 1, 1], [], []>} : vector<16x16xbf16>, vector<16x256xbf16>, vector<16x256xf32> -> vector<16x256xf32>
      %c0_61 = arith.constant 0 : index
      %c113_62 = arith.constant 113 : index
      %118 = vector.load %arg13[%c0_61, %c113_62] : memref<16x512xf32, #tpu.memory_space<vmem>>, vector<16x256xf32>
      %119 = arith.truncf %118 : vector<16x256xf32> to vector<16x256xbf16>
      %120 = vector.extract_strided_slice %103 {offsets = [2, 0, 0], sizes = [1, 16, 16], strides = [1, 1, 1]} : vector<9x16x16xbf16> to vector<1x16x16xbf16>
      %121 = vector.shape_cast %120 : vector<1x16x16xbf16> to vector<16x16xbf16>
      %cst_63 = arith.constant dense<0.000000e+00> : vector<16x256xf32>
      %122 = tpu.matmul %121, %119, %cst_63 {dimension_numbers = #tpu.dot_dimension_numbers<[1], [0], [0], [1], [0, 0, 1, 1], [], []>} : vector<16x16xbf16>, vector<16x256xbf16>, vector<16x256xf32> -> vector<16x256xf32>
      %c0_64 = arith.constant 0 : index
      %c127_65 = arith.constant 127 : index
      %123 = vector.load %arg13[%c0_64, %c127_65] : memref<16x512xf32, #tpu.memory_space<vmem>>, vector<16x256xf32>
      %124 = arith.truncf %123 : vector<16x256xf32> to vector<16x256xbf16>
      %125 = vector.extract_strided_slice %103 {offsets = [3, 0, 0], sizes = [1, 16, 16], strides = [1, 1, 1]} : vector<9x16x16xbf16> to vector<1x16x16xbf16>
      %126 = vector.shape_cast %125 : vector<1x16x16xbf16> to vector<16x16xbf16>
      %cst_66 = arith.constant dense<0.000000e+00> : vector<16x256xf32>
      %127 = tpu.matmul %126, %124, %cst_66 {dimension_numbers = #tpu.dot_dimension_numbers<[1], [0], [0], [1], [0, 0, 1, 1], [], []>} : vector<16x16xbf16>, vector<16x256xbf16>, vector<16x256xf32> -> vector<16x256xf32>
      %128 = arith.addf %112, %127 : vector<16x256xf32>
      %c0_67 = arith.constant 0 : index
      %c128_68 = arith.constant 128 : index
      %129 = vector.load %arg13[%c0_67, %c128_68] : memref<16x512xf32, #tpu.memory_space<vmem>>, vector<16x256xf32>
      %130 = arith.truncf %129 : vector<16x256xf32> to vector<16x256xbf16>
      %131 = vector.extract_strided_slice %103 {offsets = [4, 0, 0], sizes = [1, 16, 16], strides = [1, 1, 1]} : vector<9x16x16xbf16> to vector<1x16x16xbf16>
      %132 = vector.shape_cast %131 : vector<1x16x16xbf16> to vector<16x16xbf16>
      %cst_69 = arith.constant dense<0.000000e+00> : vector<16x256xf32>
      %133 = tpu.matmul %132, %130, %cst_69 {dimension_numbers = #tpu.dot_dimension_numbers<[1], [0], [0], [1], [0, 0, 1, 1], [], []>} : vector<16x16xbf16>, vector<16x256xbf16>, vector<16x256xf32> -> vector<16x256xf32>
      %134 = arith.addf %117, %133 : vector<16x256xf32>
      %c0_70 = arith.constant 0 : index
      %c129_71 = arith.constant 129 : index
      %135 = vector.load %arg13[%c0_70, %c129_71] : memref<16x512xf32, #tpu.memory_space<vmem>>, vector<16x256xf32>
      %136 = arith.truncf %135 : vector<16x256xf32> to vector<16x256xbf16>
      %137 = vector.extract_strided_slice %103 {offsets = [5, 0, 0], sizes = [1, 16, 16], strides = [1, 1, 1]} : vector<9x16x16xbf16> to vector<1x16x16xbf16>
      %138 = vector.shape_cast %137 : vector<1x16x16xbf16> to vector<16x16xbf16>
      %cst_72 = arith.constant dense<0.000000e+00> : vector<16x256xf32>
      %139 = tpu.matmul %138, %136, %cst_72 {dimension_numbers = #tpu.dot_dimension_numbers<[1], [0], [0], [1], [0, 0, 1, 1], [], []>} : vector<16x16xbf16>, vector<16x256xbf16>, vector<16x256xf32> -> vector<16x256xf32>
      %140 = arith.addf %122, %139 : vector<16x256xf32>
      %c0_73 = arith.constant 0 : index
      %c143_74 = arith.constant 143 : index
      %141 = vector.load %arg13[%c0_73, %c143_74] : memref<16x512xf32, #tpu.memory_space<vmem>>, vector<16x256xf32>
      %142 = arith.truncf %141 : vector<16x256xf32> to vector<16x256xbf16>
      %143 = vector.extract_strided_slice %103 {offsets = [6, 0, 0], sizes = [1, 16, 16], strides = [1, 1, 1]} : vector<9x16x16xbf16> to vector<1x16x16xbf16>
      %144 = vector.shape_cast %143 : vector<1x16x16xbf16> to vector<16x16xbf16>
      %cst_75 = arith.constant dense<0.000000e+00> : vector<16x256xf32>
      %145 = tpu.matmul %144, %142, %cst_75 {dimension_numbers = #tpu.dot_dimension_numbers<[1], [0], [0], [1], [0, 0, 1, 1], [], []>} : vector<16x16xbf16>, vector<16x256xbf16>, vector<16x256xf32> -> vector<16x256xf32>
      %146 = arith.addf %128, %145 : vector<16x256xf32>
      %c0_76 = arith.constant 0 : index
      %c144_77 = arith.constant 144 : index
      %147 = vector.load %arg13[%c0_76, %c144_77] : memref<16x512xf32, #tpu.memory_space<vmem>>, vector<16x256xf32>
      %148 = arith.truncf %147 : vector<16x256xf32> to vector<16x256xbf16>
      %149 = vector.extract_strided_slice %103 {offsets = [7, 0, 0], sizes = [1, 16, 16], strides = [1, 1, 1]} : vector<9x16x16xbf16> to vector<1x16x16xbf16>
      %150 = vector.shape_cast %149 : vector<1x16x16xbf16> to vector<16x16xbf16>
      %cst_78 = arith.constant dense<0.000000e+00> : vector<16x256xf32>
      %151 = tpu.matmul %150, %148, %cst_78 {dimension_numbers = #tpu.dot_dimension_numbers<[1], [0], [0], [1], [0, 0, 1, 1], [], []>} : vector<16x16xbf16>, vector<16x256xbf16>, vector<16x256xf32> -> vector<16x256xf32>
      %152 = arith.addf %134, %151 : vector<16x256xf32>
      %c0_79 = arith.constant 0 : index
      %c145_80 = arith.constant 145 : index
      %153 = vector.load %arg13[%c0_79, %c145_80] : memref<16x512xf32, #tpu.memory_space<vmem>>, vector<16x256xf32>
      %154 = arith.truncf %153 : vector<16x256xf32> to vector<16x256xbf16>
      %155 = vector.extract_strided_slice %103 {offsets = [8, 0, 0], sizes = [1, 16, 16], strides = [1, 1, 1]} : vector<9x16x16xbf16> to vector<1x16x16xbf16>
      %156 = vector.shape_cast %155 : vector<1x16x16xbf16> to vector<16x16xbf16>
      %cst_81 = arith.constant dense<0.000000e+00> : vector<16x256xf32>
      %157 = tpu.matmul %156, %154, %cst_81 {dimension_numbers = #tpu.dot_dimension_numbers<[1], [0], [0], [1], [0, 0, 1, 1], [], []>} : vector<16x16xbf16>, vector<16x256xbf16>, vector<16x256xf32> -> vector<16x256xf32>
      %158 = arith.addf %140, %157 : vector<16x256xf32>
      %159 = vector.broadcast %20 : vector<1x256xf32> to vector<16x256xf32>
      %160 = arith.mulf %146, %159 : vector<16x256xf32>
      %161 = arith.addf %152, %160 : vector<16x256xf32>
      %162 = vector.broadcast %24 : vector<1x256xf32> to vector<16x256xf32>
      %163 = arith.mulf %158, %162 : vector<16x256xf32>
      %164 = arith.addf %161, %163 : vector<16x256xf32>
      %165 = vector.broadcast %106 : vector<16x1xf32> to vector<16x256xf32>
      %166 = arith.addf %164, %165 : vector<16x256xf32>
      %cst_82 = arith.constant 0.000000e+00 : f32
      %167 = vector.broadcast %cst_82 : f32 to vector<16x256xf32>
      %168 = arith.maximumf %166, %167 : vector<16x256xf32>
      %169 = arith.index_cast %arg15 : i32 to index
      %c0_83 = arith.constant 0 : index
      %c0_84 = arith.constant 0 : index
      %c0_85 = arith.constant 0 : index
      %170 = vector.load %arg4[%169, %c0_83, %c0_84, %c0_85] : memref<2x9x16x16xbf16, #tpu.memory_space<vmem>>, vector<1x9x16x16xbf16>
      %171 = vector.shape_cast %170 : vector<1x9x16x16xbf16> to vector<9x16x16xbf16>
      %172 = arith.index_cast %arg15 : i32 to index
      %c0_86 = arith.constant 0 : index
      %c0_87 = arith.constant 0 : index
      %173 = vector.load %arg5[%172, %c0_86, %c0_87] : memref<2x16x1xf32, #tpu.memory_space<vmem>>, vector<1x16x1xf32>
      %174 = vector.shape_cast %173 : vector<1x16x1xf32> to vector<16x1xf32>
      %c0_88 = arith.constant 0 : index
      %c128_89 = arith.constant 128 : index
      %175 = vector.load %arg13[%c0_88, %c128_89] : memref<16x512xf32, #tpu.memory_space<vmem>>, vector<16x256xf32>
      tpu.vector_store %arg13[%c0_88, %c128_89], %168 {strides = array<i32>} : memref<16x512xf32, #tpu.memory_space<vmem>>, vector<16x256xf32>,
      %c0_90 = arith.constant 0 : index
      %c111_91 = arith.constant 111 : index
      %176 = vector.load %arg13[%c0_90, %c111_91] : memref<16x512xf32, #tpu.memory_space<vmem>>, vector<16x256xf32>
      %177 = arith.truncf %176 : vector<16x256xf32> to vector<16x256xbf16>
      %178 = vector.extract_strided_slice %171 {offsets = [0, 0, 0], sizes = [1, 16, 16], strides = [1, 1, 1]} : vector<9x16x16xbf16> to vector<1x16x16xbf16>
      %179 = vector.shape_cast %178 : vector<1x16x16xbf16> to vector<16x16xbf16>
      %cst_92 = arith.constant dense<0.000000e+00> : vector<16x256xf32>
      %180 = tpu.matmul %179, %177, %cst_92 {dimension_numbers = #tpu.dot_dimension_numbers<[1], [0], [0], [1], [0, 0, 1, 1], [], []>} : vector<16x16xbf16>, vector<16x256xbf16>, vector<16x256xf32> -> vector<16x256xf32>
      %c0_93 = arith.constant 0 : index
      %c112_94 = arith.constant 112 : index
      %181 = vector.load %arg13[%c0_93, %c112_94] : memref<16x512xf32, #tpu.memory_space<vmem>>, vector<16x256xf32>
      %182 = arith.truncf %181 : vector<16x256xf32> to vector<16x256xbf16>
      %183 = vector.extract_strided_slice %171 {offsets = [1, 0, 0], sizes = [1, 16, 16], strides = [1, 1, 1]} : vector<9x16x16xbf16> to vector<1x16x16xbf16>
      %184 = vector.shape_cast %183 : vector<1x16x16xbf16> to vector<16x16xbf16>
      %cst_95 = arith.constant dense<0.000000e+00> : vector<16x256xf32>
      %185 = tpu.matmul %184, %182, %cst_95 {dimension_numbers = #tpu.dot_dimension_numbers<[1], [0], [0], [1], [0, 0, 1, 1], [], []>} : vector<16x16xbf16>, vector<16x256xbf16>, vector<16x256xf32> -> vector<16x256xf32>
      %c0_96 = arith.constant 0 : index
      %c113_97 = arith.constant 113 : index
      %186 = vector.load %arg13[%c0_96, %c113_97] : memref<16x512xf32, #tpu.memory_space<vmem>>, vector<16x256xf32>
      %187 = arith.truncf %186 : vector<16x256xf32> to vector<16x256xbf16>
      %188 = vector.extract_strided_slice %171 {offsets = [2, 0, 0], sizes = [1, 16, 16], strides = [1, 1, 1]} : vector<9x16x16xbf16> to vector<1x16x16xbf16>
      %189 = vector.shape_cast %188 : vector<1x16x16xbf16> to vector<16x16xbf16>
      %cst_98 = arith.constant dense<0.000000e+00> : vector<16x256xf32>
      %190 = tpu.matmul %189, %187, %cst_98 {dimension_numbers = #tpu.dot_dimension_numbers<[1], [0], [0], [1], [0, 0, 1, 1], [], []>} : vector<16x16xbf16>, vector<16x256xbf16>, vector<16x256xf32> -> vector<16x256xf32>
      %c0_99 = arith.constant 0 : index
      %c127_100 = arith.constant 127 : index
      %191 = vector.load %arg13[%c0_99, %c127_100] : memref<16x512xf32, #tpu.memory_space<vmem>>, vector<16x256xf32>
      %192 = arith.truncf %191 : vector<16x256xf32> to vector<16x256xbf16>
      %193 = vector.extract_strided_slice %171 {offsets = [3, 0, 0], sizes = [1, 16, 16], strides = [1, 1, 1]} : vector<9x16x16xbf16> to vector<1x16x16xbf16>
      %194 = vector.shape_cast %193 : vector<1x16x16xbf16> to vector<16x16xbf16>
      %cst_101 = arith.constant dense<0.000000e+00> : vector<16x256xf32>
      %195 = tpu.matmul %194, %192, %cst_101 {dimension_numbers = #tpu.dot_dimension_numbers<[1], [0], [0], [1], [0, 0, 1, 1], [], []>} : vector<16x16xbf16>, vector<16x256xbf16>, vector<16x256xf32> -> vector<16x256xf32>
      %196 = arith.addf %180, %195 : vector<16x256xf32>
      %c0_102 = arith.constant 0 : index
      %c128_103 = arith.constant 128 : index
      %197 = vector.load %arg13[%c0_102, %c128_103] : memref<16x512xf32, #tpu.memory_space<vmem>>, vector<16x256xf32>
      %198 = arith.truncf %197 : vector<16x256xf32> to vector<16x256xbf16>
      %199 = vector.extract_strided_slice %171 {offsets = [4, 0, 0], sizes = [1, 16, 16], strides = [1, 1, 1]} : vector<9x16x16xbf16> to vector<1x16x16xbf16>
      %200 = vector.shape_cast %199 : vector<1x16x16xbf16> to vector<16x16xbf16>
      %cst_104 = arith.constant dense<0.000000e+00> : vector<16x256xf32>
      %201 = tpu.matmul %200, %198, %cst_104 {dimension_numbers = #tpu.dot_dimension_numbers<[1], [0], [0], [1], [0, 0, 1, 1], [], []>} : vector<16x16xbf16>, vector<16x256xbf16>, vector<16x256xf32> -> vector<16x256xf32>
      %202 = arith.addf %185, %201 : vector<16x256xf32>
      %c0_105 = arith.constant 0 : index
      %c129_106 = arith.constant 129 : index
      %203 = vector.load %arg13[%c0_105, %c129_106] : memref<16x512xf32, #tpu.memory_space<vmem>>, vector<16x256xf32>
      %204 = arith.truncf %203 : vector<16x256xf32> to vector<16x256xbf16>
      %205 = vector.extract_strided_slice %171 {offsets = [5, 0, 0], sizes = [1, 16, 16], strides = [1, 1, 1]} : vector<9x16x16xbf16> to vector<1x16x16xbf16>
      %206 = vector.shape_cast %205 : vector<1x16x16xbf16> to vector<16x16xbf16>
      %cst_107 = arith.constant dense<0.000000e+00> : vector<16x256xf32>
      %207 = tpu.matmul %206, %204, %cst_107 {dimension_numbers = #tpu.dot_dimension_numbers<[1], [0], [0], [1], [0, 0, 1, 1], [], []>} : vector<16x16xbf16>, vector<16x256xbf16>, vector<16x256xf32> -> vector<16x256xf32>
      %208 = arith.addf %190, %207 : vector<16x256xf32>
      %c0_108 = arith.constant 0 : index
      %c143_109 = arith.constant 143 : index
      %209 = vector.load %arg13[%c0_108, %c143_109] : memref<16x512xf32, #tpu.memory_space<vmem>>, vector<16x256xf32>
      %210 = arith.truncf %209 : vector<16x256xf32> to vector<16x256xbf16>
      %211 = vector.extract_strided_slice %171 {offsets = [6, 0, 0], sizes = [1, 16, 16], strides = [1, 1, 1]} : vector<9x16x16xbf16> to vector<1x16x16xbf16>
      %212 = vector.shape_cast %211 : vector<1x16x16xbf16> to vector<16x16xbf16>
      %cst_110 = arith.constant dense<0.000000e+00> : vector<16x256xf32>
      %213 = tpu.matmul %212, %210, %cst_110 {dimension_numbers = #tpu.dot_dimension_numbers<[1], [0], [0], [1], [0, 0, 1, 1], [], []>} : vector<16x16xbf16>, vector<16x256xbf16>, vector<16x256xf32> -> vector<16x256xf32>
      %214 = arith.addf %196, %213 : vector<16x256xf32>
      %c0_111 = arith.constant 0 : index
      %c144_112 = arith.constant 144 : index
      %215 = vector.load %arg13[%c0_111, %c144_112] : memref<16x512xf32, #tpu.memory_space<vmem>>, vector<16x256xf32>
      %216 = arith.truncf %215 : vector<16x256xf32> to vector<16x256xbf16>
      %217 = vector.extract_strided_slice %171 {offsets = [7, 0, 0], sizes = [1, 16, 16], strides = [1, 1, 1]} : vector<9x16x16xbf16> to vector<1x16x16xbf16>
      %218 = vector.shape_cast %217 : vector<1x16x16xbf16> to vector<16x16xbf16>
      %cst_113 = arith.constant dense<0.000000e+00> : vector<16x256xf32>
      %219 = tpu.matmul %218, %216, %cst_113 {dimension_numbers = #tpu.dot_dimension_numbers<[1], [0], [0], [1], [0, 0, 1, 1], [], []>} : vector<16x16xbf16>, vector<16x256xbf16>, vector<16x256xf32> -> vector<16x256xf32>
      %220 = arith.addf %202, %219 : vector<16x256xf32>
      %c0_114 = arith.constant 0 : index
      %c145_115 = arith.constant 145 : index
      %221 = vector.load %arg13[%c0_114, %c145_115] : memref<16x512xf32, #tpu.memory_space<vmem>>, vector<16x256xf32>
      %222 = arith.truncf %221 : vector<16x256xf32> to vector<16x256xbf16>
      %223 = vector.extract_strided_slice %171 {offsets = [8, 0, 0], sizes = [1, 16, 16], strides = [1, 1, 1]} : vector<9x16x16xbf16> to vector<1x16x16xbf16>
      %224 = vector.shape_cast %223 : vector<1x16x16xbf16> to vector<16x16xbf16>
      %cst_116 = arith.constant dense<0.000000e+00> : vector<16x256xf32>
      %225 = tpu.matmul %224, %222, %cst_116 {dimension_numbers = #tpu.dot_dimension_numbers<[1], [0], [0], [1], [0, 0, 1, 1], [], []>} : vector<16x16xbf16>, vector<16x256xbf16>, vector<16x256xf32> -> vector<16x256xf32>
      %226 = arith.addf %208, %225 : vector<16x256xf32>
      %227 = vector.broadcast %20 : vector<1x256xf32> to vector<16x256xf32>
      %228 = arith.mulf %214, %227 : vector<16x256xf32>
      %229 = arith.addf %220, %228 : vector<16x256xf32>
      %230 = vector.broadcast %24 : vector<1x256xf32> to vector<16x256xf32>
      %231 = arith.mulf %226, %230 : vector<16x256xf32>
      %232 = arith.addf %229, %231 : vector<16x256xf32>
      %233 = vector.broadcast %174 : vector<16x1xf32> to vector<16x256xf32>
      %234 = arith.addf %232, %233 : vector<16x256xf32>
      %cst_117 = arith.constant dense<0.000000e+00> : vector<16xf32>
      %235 = vector.multi_reduction <add>, %234, %cst_117 [1] : vector<16x256xf32> to vector<16xf32>
      %236 = vector.shape_cast %235 : vector<16xf32> to vector<16x1xf32>
      %cst_118 = arith.constant 3.906250e-03 : f32
      %237 = vector.broadcast %cst_118 : f32 to vector<16x1xf32>
      %238 = arith.mulf %236, %237 : vector<16x1xf32>
      %239 = arith.index_cast %arg15 : i32 to index
      %c0_119 = arith.constant 0 : index
      %c0_120 = arith.constant 0 : index
      %240 = vector.load %arg6[%239, %c0_119, %c0_120] : memref<2x4x16xf32, #tpu.memory_space<vmem>>, vector<1x4x16xf32>
      %241 = vector.shape_cast %240 : vector<1x4x16xf32> to vector<4x16xf32>
      %cst_121 = arith.constant dense<0.000000e+00> : vector<4x1xf32>
      %242 = tpu.matmul %241, %238, %cst_121 {dimension_numbers = #tpu.dot_dimension_numbers<[1], [0], [0], [1], [0, 0, 1, 1], [], []>} : vector<4x16xf32>, vector<16x1xf32>, vector<4x1xf32> -> vector<4x1xf32>
      %243 = arith.index_cast %arg15 : i32 to index
      %c0_122 = arith.constant 0 : index
      %c0_123 = arith.constant 0 : index
      %244 = vector.load %arg7[%243, %c0_122, %c0_123] : memref<2x4x1xf32, #tpu.memory_space<vmem>>, vector<1x4x1xf32>
      %245 = vector.shape_cast %244 : vector<1x4x1xf32> to vector<4x1xf32>
      %246 = arith.addf %242, %245 : vector<4x1xf32>
      %cst_124 = arith.constant 0.000000e+00 : f32
      %247 = vector.broadcast %cst_124 : f32 to vector<4x1xf32>
      %248 = arith.maximumf %246, %247 : vector<4x1xf32>
      %249 = arith.index_cast %arg15 : i32 to index
      %c0_125 = arith.constant 0 : index
      %c0_126 = arith.constant 0 : index
      %250 = vector.load %arg8[%249, %c0_125, %c0_126] : memref<2x16x4xf32, #tpu.memory_space<vmem>>, vector<1x16x4xf32>
      %251 = vector.shape_cast %250 : vector<1x16x4xf32> to vector<16x4xf32>
      %cst_127 = arith.constant dense<0.000000e+00> : vector<16x1xf32>
      %252 = tpu.matmul %251, %248, %cst_127 {dimension_numbers = #tpu.dot_dimension_numbers<[1], [0], [0], [1], [0, 0, 1, 1], [], []>} : vector<16x4xf32>, vector<4x1xf32>, vector<16x1xf32> -> vector<16x1xf32>
      %253 = arith.index_cast %arg15 : i32 to index
      %c0_128 = arith.constant 0 : index
      %c0_129 = arith.constant 0 : index
      %254 = vector.load %arg9[%253, %c0_128, %c0_129] : memref<2x16x1xf32, #tpu.memory_space<vmem>>, vector<1x16x1xf32>
      %255 = vector.shape_cast %254 : vector<1x16x1xf32> to vector<16x1xf32>
      %256 = arith.addf %252, %255 : vector<16x1xf32>
      %257 = arith.negf %256 : vector<16x1xf32>
      %258 = math.exp %257 : vector<16x1xf32>
      %cst_130 = arith.constant 1.000000e+00 : f32
      %259 = vector.broadcast %cst_130 : f32 to vector<16x1xf32>
      %260 = arith.addf %259, %258 : vector<16x1xf32>
      %261 = arith.divf %259, %260 : vector<16x1xf32>
      %262 = vector.broadcast %261 : vector<16x1xf32> to vector<16x256xf32>
      %263 = arith.mulf %234, %262 : vector<16x256xf32>
      %c0_131 = arith.constant 0 : index
      %c0_132 = arith.constant 0 : index
      %264 = vector.load %arg14[%c0_131, %c0_132] : memref<16x256xf32, #tpu.memory_space<vmem>>, vector<16x256xf32>
      %265 = arith.addf %263, %264 : vector<16x256xf32>
      %c0_133 = arith.constant 0 : index
      %c0_134 = arith.constant 0 : index
      %266 = vector.load %arg14[%c0_133, %c0_134] : memref<16x256xf32, #tpu.memory_space<vmem>>, vector<16x256xf32>
      tpu.vector_store %arg14[%c0_133, %c0_134], %265 {strides = array<i32>} : memref<16x256xf32, #tpu.memory_space<vmem>>, vector<16x256xf32>,
    }
    %c2_i32_12 = arith.constant 2 : i32
    %c0_13 = arith.constant 0 : index
    %c0_14 = arith.constant 0 : index
    %31 = vector.load %arg14[%c0_13, %c0_14] : memref<16x256xf32, #tpu.memory_space<vmem>>, vector<16x256xf32>
    %c0_15 = arith.constant 0 : index
    %c0_16 = arith.constant 0 : index
    %c0_17 = arith.constant 0 : index
    %32 = vector.load %arg10[%c0_15, %c0_16, %c0_17] : memref<9x16x16xbf16, #tpu.memory_space<vmem>>, vector<9x16x16xbf16>
    %c0_18 = arith.constant 0 : index
    %c0_19 = arith.constant 0 : index
    %33 = vector.load %arg11[%c0_18, %c0_19] : memref<16x1xf32, #tpu.memory_space<vmem>>, vector<16x1xf32>
    %c0_20 = arith.constant 0 : index
    %c128 = arith.constant 128 : index
    %34 = vector.load %arg13[%c0_20, %c128] : memref<16x512xf32, #tpu.memory_space<vmem>>, vector<16x256xf32>
    tpu.vector_store %arg13[%c0_20, %c128], %31 {strides = array<i32>} : memref<16x512xf32, #tpu.memory_space<vmem>>, vector<16x256xf32>,
    %c0_21 = arith.constant 0 : index
    %c111 = arith.constant 111 : index
    %35 = vector.load %arg13[%c0_21, %c111] : memref<16x512xf32, #tpu.memory_space<vmem>>, vector<16x256xf32>
    %36 = arith.truncf %35 : vector<16x256xf32> to vector<16x256xbf16>
    %37 = vector.extract_strided_slice %32 {offsets = [0, 0, 0], sizes = [1, 16, 16], strides = [1, 1, 1]} : vector<9x16x16xbf16> to vector<1x16x16xbf16>
    %38 = vector.shape_cast %37 : vector<1x16x16xbf16> to vector<16x16xbf16>
    %cst_22 = arith.constant dense<0.000000e+00> : vector<16x256xf32>
    %39 = tpu.matmul %38, %36, %cst_22 {dimension_numbers = #tpu.dot_dimension_numbers<[1], [0], [0], [1], [0, 0, 1, 1], [], []>} : vector<16x16xbf16>, vector<16x256xbf16>, vector<16x256xf32> -> vector<16x256xf32>
    %c0_23 = arith.constant 0 : index
    %c112 = arith.constant 112 : index
    %40 = vector.load %arg13[%c0_23, %c112] : memref<16x512xf32, #tpu.memory_space<vmem>>, vector<16x256xf32>
    %41 = arith.truncf %40 : vector<16x256xf32> to vector<16x256xbf16>
    %42 = vector.extract_strided_slice %32 {offsets = [1, 0, 0], sizes = [1, 16, 16], strides = [1, 1, 1]} : vector<9x16x16xbf16> to vector<1x16x16xbf16>
    %43 = vector.shape_cast %42 : vector<1x16x16xbf16> to vector<16x16xbf16>
    %cst_24 = arith.constant dense<0.000000e+00> : vector<16x256xf32>
    %44 = tpu.matmul %43, %41, %cst_24 {dimension_numbers = #tpu.dot_dimension_numbers<[1], [0], [0], [1], [0, 0, 1, 1], [], []>} : vector<16x16xbf16>, vector<16x256xbf16>, vector<16x256xf32> -> vector<16x256xf32>
    %c0_25 = arith.constant 0 : index
    %c113 = arith.constant 113 : index
    %45 = vector.load %arg13[%c0_25, %c113] : memref<16x512xf32, #tpu.memory_space<vmem>>, vector<16x256xf32>
    %46 = arith.truncf %45 : vector<16x256xf32> to vector<16x256xbf16>
    %47 = vector.extract_strided_slice %32 {offsets = [2, 0, 0], sizes = [1, 16, 16], strides = [1, 1, 1]} : vector<9x16x16xbf16> to vector<1x16x16xbf16>
    %48 = vector.shape_cast %47 : vector<1x16x16xbf16> to vector<16x16xbf16>
    %cst_26 = arith.constant dense<0.000000e+00> : vector<16x256xf32>
    %49 = tpu.matmul %48, %46, %cst_26 {dimension_numbers = #tpu.dot_dimension_numbers<[1], [0], [0], [1], [0, 0, 1, 1], [], []>} : vector<16x16xbf16>, vector<16x256xbf16>, vector<16x256xf32> -> vector<16x256xf32>
    %c0_27 = arith.constant 0 : index
    %c127 = arith.constant 127 : index
    %50 = vector.load %arg13[%c0_27, %c127] : memref<16x512xf32, #tpu.memory_space<vmem>>, vector<16x256xf32>
    %51 = arith.truncf %50 : vector<16x256xf32> to vector<16x256xbf16>
    %52 = vector.extract_strided_slice %32 {offsets = [3, 0, 0], sizes = [1, 16, 16], strides = [1, 1, 1]} : vector<9x16x16xbf16> to vector<1x16x16xbf16>
    %53 = vector.shape_cast %52 : vector<1x16x16xbf16> to vector<16x16xbf16>
    %cst_28 = arith.constant dense<0.000000e+00> : vector<16x256xf32>
    %54 = tpu.matmul %53, %51, %cst_28 {dimension_numbers = #tpu.dot_dimension_numbers<[1], [0], [0], [1], [0, 0, 1, 1], [], []>} : vector<16x16xbf16>, vector<16x256xbf16>, vector<16x256xf32> -> vector<16x256xf32>
    %55 = arith.addf %39, %54 : vector<16x256xf32>
    %c0_29 = arith.constant 0 : index
    %c128_30 = arith.constant 128 : index
    %56 = vector.load %arg13[%c0_29, %c128_30] : memref<16x512xf32, #tpu.memory_space<vmem>>, vector<16x256xf32>
    %57 = arith.truncf %56 : vector<16x256xf32> to vector<16x256xbf16>
    %58 = vector.extract_strided_slice %32 {offsets = [4, 0, 0], sizes = [1, 16, 16], strides = [1, 1, 1]} : vector<9x16x16xbf16> to vector<1x16x16xbf16>
    %59 = vector.shape_cast %58 : vector<1x16x16xbf16> to vector<16x16xbf16>
    %cst_31 = arith.constant dense<0.000000e+00> : vector<16x256xf32>
    %60 = tpu.matmul %59, %57, %cst_31 {dimension_numbers = #tpu.dot_dimension_numbers<[1], [0], [0], [1], [0, 0, 1, 1], [], []>} : vector<16x16xbf16>, vector<16x256xbf16>, vector<16x256xf32> -> vector<16x256xf32>
    %61 = arith.addf %44, %60 : vector<16x256xf32>
    %c0_32 = arith.constant 0 : index
    %c129 = arith.constant 129 : index
    %62 = vector.load %arg13[%c0_32, %c129] : memref<16x512xf32, #tpu.memory_space<vmem>>, vector<16x256xf32>
    %63 = arith.truncf %62 : vector<16x256xf32> to vector<16x256xbf16>
    %64 = vector.extract_strided_slice %32 {offsets = [5, 0, 0], sizes = [1, 16, 16], strides = [1, 1, 1]} : vector<9x16x16xbf16> to vector<1x16x16xbf16>
    %65 = vector.shape_cast %64 : vector<1x16x16xbf16> to vector<16x16xbf16>
    %cst_33 = arith.constant dense<0.000000e+00> : vector<16x256xf32>
    %66 = tpu.matmul %65, %63, %cst_33 {dimension_numbers = #tpu.dot_dimension_numbers<[1], [0], [0], [1], [0, 0, 1, 1], [], []>} : vector<16x16xbf16>, vector<16x256xbf16>, vector<16x256xf32> -> vector<16x256xf32>
    %67 = arith.addf %49, %66 : vector<16x256xf32>
    %c0_34 = arith.constant 0 : index
    %c143 = arith.constant 143 : index
    %68 = vector.load %arg13[%c0_34, %c143] : memref<16x512xf32, #tpu.memory_space<vmem>>, vector<16x256xf32>
    %69 = arith.truncf %68 : vector<16x256xf32> to vector<16x256xbf16>
    %70 = vector.extract_strided_slice %32 {offsets = [6, 0, 0], sizes = [1, 16, 16], strides = [1, 1, 1]} : vector<9x16x16xbf16> to vector<1x16x16xbf16>
    %71 = vector.shape_cast %70 : vector<1x16x16xbf16> to vector<16x16xbf16>
    %cst_35 = arith.constant dense<0.000000e+00> : vector<16x256xf32>
    %72 = tpu.matmul %71, %69, %cst_35 {dimension_numbers = #tpu.dot_dimension_numbers<[1], [0], [0], [1], [0, 0, 1, 1], [], []>} : vector<16x16xbf16>, vector<16x256xbf16>, vector<16x256xf32> -> vector<16x256xf32>
    %73 = arith.addf %55, %72 : vector<16x256xf32>
    %c0_36 = arith.constant 0 : index
    %c144 = arith.constant 144 : index
    %74 = vector.load %arg13[%c0_36, %c144] : memref<16x512xf32, #tpu.memory_space<vmem>>, vector<16x256xf32>
    %75 = arith.truncf %74 : vector<16x256xf32> to vector<16x256xbf16>
    %76 = vector.extract_strided_slice %32 {offsets = [7, 0, 0], sizes = [1, 16, 16], strides = [1, 1, 1]} : vector<9x16x16xbf16> to vector<1x16x16xbf16>
    %77 = vector.shape_cast %76 : vector<1x16x16xbf16> to vector<16x16xbf16>
    %cst_37 = arith.constant dense<0.000000e+00> : vector<16x256xf32>
    %78 = tpu.matmul %77, %75, %cst_37 {dimension_numbers = #tpu.dot_dimension_numbers<[1], [0], [0], [1], [0, 0, 1, 1], [], []>} : vector<16x16xbf16>, vector<16x256xbf16>, vector<16x256xf32> -> vector<16x256xf32>
    %79 = arith.addf %61, %78 : vector<16x256xf32>
    %c0_38 = arith.constant 0 : index
    %c145 = arith.constant 145 : index
    %80 = vector.load %arg13[%c0_38, %c145] : memref<16x512xf32, #tpu.memory_space<vmem>>, vector<16x256xf32>
    %81 = arith.truncf %80 : vector<16x256xf32> to vector<16x256xbf16>
    %82 = vector.extract_strided_slice %32 {offsets = [8, 0, 0], sizes = [1, 16, 16], strides = [1, 1, 1]} : vector<9x16x16xbf16> to vector<1x16x16xbf16>
    %83 = vector.shape_cast %82 : vector<1x16x16xbf16> to vector<16x16xbf16>
    %cst_39 = arith.constant dense<0.000000e+00> : vector<16x256xf32>
    %84 = tpu.matmul %83, %81, %cst_39 {dimension_numbers = #tpu.dot_dimension_numbers<[1], [0], [0], [1], [0, 0, 1, 1], [], []>} : vector<16x16xbf16>, vector<16x256xbf16>, vector<16x256xf32> -> vector<16x256xf32>
    %85 = arith.addf %67, %84 : vector<16x256xf32>
    %86 = vector.broadcast %20 : vector<1x256xf32> to vector<16x256xf32>
    %87 = arith.mulf %73, %86 : vector<16x256xf32>
    %88 = arith.addf %79, %87 : vector<16x256xf32>
    %89 = vector.broadcast %24 : vector<1x256xf32> to vector<16x256xf32>
    %90 = arith.mulf %85, %89 : vector<16x256xf32>
    %91 = arith.addf %88, %90 : vector<16x256xf32>
    %92 = vector.broadcast %33 : vector<16x1xf32> to vector<16x256xf32>
    %93 = arith.addf %91, %92 : vector<16x256xf32>
    %c0_40 = arith.constant 0 : index
    %c0_41 = arith.constant 0 : index
    %c0_42 = arith.constant 0 : index
    %94 = vector.load %arg1[%c0_40, %c0_41, %c0_42] : memref<1x16x256xf32, #tpu.memory_space<vmem>>, vector<1x16x256xf32>
    %95 = vector.shape_cast %94 : vector<1x16x256xf32> to vector<16x256xf32>
    %96 = arith.addf %93, %95 : vector<16x256xf32>
    %c0_43 = arith.constant 0 : index
    %c0_44 = arith.constant 0 : index
    %c0_45 = arith.constant 0 : index
    %97 = vector.load %arg12[%c0_43, %c0_44, %c0_45] : memref<1x16x256xf32, #tpu.memory_space<vmem>>, vector<1x16x256xf32>
    %98 = vector.shape_cast %97 : vector<1x16x256xf32> to vector<16x256xf32>
    %99 = vector.shape_cast %96 : vector<16x256xf32> to vector<1x16x256xf32>
    tpu.vector_store %arg12[%c0_43, %c0_44, %c0_45], %99 {strides = array<i32>} : memref<1x16x256xf32, #tpu.memory_space<vmem>>, vector<1x16x256xf32>,
    return
  }
  func.func @transform_0(%arg0: i32) -> (i32, i32, i32) {
    %c0_i32 = arith.constant 0 : i32
    %c0_i32_0 = arith.constant 0 : i32
    %c0_i32_1 = arith.constant 0 : i32
    return %arg0, %c0_i32, %c0_i32_0 : i32, i32, i32
  }
  func.func @transform_1(%arg0: i32) -> (i32, i32, i32, i32) {
    %c0_i32 = arith.constant 0 : i32
    %c0_i32_0 = arith.constant 0 : i32
    %c0_i32_1 = arith.constant 0 : i32
    %c0_i32_2 = arith.constant 0 : i32
    %c0_i32_3 = arith.constant 0 : i32
    return %c0_i32, %c0_i32_0, %c0_i32_1, %c0_i32_2 : i32, i32, i32, i32
  }
  func.func @transform_2(%arg0: i32) -> (i32, i32, i32) {
    %c0_i32 = arith.constant 0 : i32
    %c0_i32_0 = arith.constant 0 : i32
    %c0_i32_1 = arith.constant 0 : i32
    %c0_i32_2 = arith.constant 0 : i32
    return %c0_i32, %c0_i32_0, %c0_i32_1 : i32, i32, i32
  }
  func.func @transform_3(%arg0: i32) -> (i32, i32, i32, i32) {
    %c0_i32 = arith.constant 0 : i32
    %c0_i32_0 = arith.constant 0 : i32
    %c0_i32_1 = arith.constant 0 : i32
    %c0_i32_2 = arith.constant 0 : i32
    %c0_i32_3 = arith.constant 0 : i32
    return %c0_i32, %c0_i32_0, %c0_i32_1, %c0_i32_2 : i32, i32, i32, i32
  }
  func.func @transform_4(%arg0: i32) -> (i32, i32, i32) {
    %c0_i32 = arith.constant 0 : i32
    %c0_i32_0 = arith.constant 0 : i32
    %c0_i32_1 = arith.constant 0 : i32
    %c0_i32_2 = arith.constant 0 : i32
    return %c0_i32, %c0_i32_0, %c0_i32_1 : i32, i32, i32
  }
  func.func @transform_5(%arg0: i32) -> (i32, i32, i32) {
    %c0_i32 = arith.constant 0 : i32
    %c0_i32_0 = arith.constant 0 : i32
    %c0_i32_1 = arith.constant 0 : i32
    %c0_i32_2 = arith.constant 0 : i32
    return %c0_i32, %c0_i32_0, %c0_i32_1 : i32, i32, i32
  }
  func.func @transform_6(%arg0: i32) -> (i32, i32, i32) {
    %c0_i32 = arith.constant 0 : i32
    %c0_i32_0 = arith.constant 0 : i32
    %c0_i32_1 = arith.constant 0 : i32
    %c0_i32_2 = arith.constant 0 : i32
    return %c0_i32, %c0_i32_0, %c0_i32_1 : i32, i32, i32
  }
  func.func @transform_7(%arg0: i32) -> (i32, i32, i32) {
    %c0_i32 = arith.constant 0 : i32
    %c0_i32_0 = arith.constant 0 : i32
    %c0_i32_1 = arith.constant 0 : i32
    %c0_i32_2 = arith.constant 0 : i32
    return %c0_i32, %c0_i32_0, %c0_i32_1 : i32, i32, i32
  }
  func.func @transform_8(%arg0: i32) -> (i32, i32, i32) {
    %c0_i32 = arith.constant 0 : i32
    %c0_i32_0 = arith.constant 0 : i32
    %c0_i32_1 = arith.constant 0 : i32
    %c0_i32_2 = arith.constant 0 : i32
    return %c0_i32, %c0_i32_0, %c0_i32_1 : i32, i32, i32
  }
  func.func @transform_9(%arg0: i32) -> (i32, i32, i32) {
    %c0_i32 = arith.constant 0 : i32
    %c0_i32_0 = arith.constant 0 : i32
    %c0_i32_1 = arith.constant 0 : i32
    %c0_i32_2 = arith.constant 0 : i32
    return %c0_i32, %c0_i32_0, %c0_i32_1 : i32, i32, i32
  }
  func.func @transform_10(%arg0: i32) -> (i32, i32) {
    %c0_i32 = arith.constant 0 : i32
    %c0_i32_0 = arith.constant 0 : i32
    %c0_i32_1 = arith.constant 0 : i32
    return %c0_i32, %c0_i32_0 : i32, i32
  }
  func.func @transform_11(%arg0: i32) -> (i32, i32, i32) {
    %c0_i32 = arith.constant 0 : i32
    %c0_i32_0 = arith.constant 0 : i32
    %c0_i32_1 = arith.constant 0 : i32
    return %arg0, %c0_i32, %c0_i32_0 : i32, i32, i32
  }
}

</mosaic_0001>

<bundles_post_ra>
// kernel: tpu_custom_call.1
= control target key start
LH: loop header
LB: loop body
LE: loop exit
PB: predicated region body
PF: predicated region fallthrough
CT: control target
= control target key end

     0   :  { %s3925_s0 = inlined_call_operand.hbm [shape: f32[2,16,256], index: 0, kind: input, shape index: {}]   ;;  %s3926_s1 = inlined_call_operand.vmem [shape: bf16[2,9,16,16], index: 1, kind: input, shape index: {}]   ;;  %s3927_s2 = inlined_call_operand.vmem [shape: f32[2,16,1], index: 2, kind: input, shape index: {}]   ;;  %s3928_s3 = inlined_call_operand.hbm [shape: bf16[2,9,16,16], index: 3, kind: input, shape index: {}]   ;;  %s3929_s4 = inlined_call_operand.vmem [shape: f32[2,16,1], index: 4, kind: input, shape index: {}]   ;;  %s3930_s5 = inlined_call_operand.vmem [shape: f32[2,4,16], index: 5, kind: input, shape index: {}]   ;;  %s3931_s6 = inlined_call_operand.vmem [shape: f32[2,4,1], index: 6, kind: input, shape index: {}]   ;;  %s3932_s7 = inlined_call_operand.vmem [shape: f32[2,16,4], index: 7, kind: input, shape index: {}]   ;;  %s3933_s8 = inlined_call_operand.vmem [shape: f32[2,16,1], index: 8, kind: input, shape index: {}]   ;;  %s3934_s9 = inlined_call_operand.hbm [shape: bf16[9,16,16], index: 9, kind: input, shape index: {}]   ;;  %s3935_s10 = inlined_call_operand.vmem [shape: f32[16,1], index: 10, kind: input, shape index: {}]   ;;  %s3936_s11 = inlined_call_operand.hbm [shape: f32[2,16,256], index: 11, kind: output, shape index: {}]  }
   0x1   :  { %3953 = sst [smem:[#allocation16_spill]] %s3925_s0 }
   0x2   :  { %3954 = sst [smem:[#allocation17_spill]] %s3926_s1 }
   0x3   :  { %3955 = sst [smem:[#allocation18_spill]] %s3936_s11 }
   0x4   :  { %16 = vsyncpa [#allocation5], 0 }
   0x5   :  { %18 = vsyncpa [#allocation5 + $0x1], 0 }
   0x6   :  { %19 = vsyncpa [#allocation8], 0 }
   0x7   :  { %20 = vsyncpa [#allocation6], 0 }
   0x8   :  { %22 = vsyncpa [#allocation6 + $0x1], 0  ;;  %s3358_s17 = smov 0   ;;  %s3360_s18 = smov 0  }
   0x9   :  { %s3362_s19 = smov 0   ;;  %s3364_s20 = smov 0  }
   0xa LB: > { %3956 = sst [smem:[#allocation14_spill]] %s3249_s17  ;;  %s3379_s21 = sadd.s32 4294967295, %s3261_s20   ;;  %s3261_s20 = sphi %s3364_s20, %s3984_s20   ;;  %s3257_s19 = sphi %s3362_s19, %s3983_s19   ;;  %s3253_s18 = sphi %s3360_s18, %s3982_s18   ;;  %s3249_s17 = sphi %s3358_s17, %s3981_s17  }
   0xb   : > { %s2777_s22 = sadd.s32 4294967294, %s3261_s20   ;;  %p48_p0 = scmp.ne.s32.totalorder %s3253_s18, %s3249_s17 }
   0xc   : > { %p3937_p1 = scmp.eq.s32.totalorder %s3379_s21, 0  ;;  %p288_p3 = scmp.eq.s32.totalorder %s2777_s22, 1 }
   0xd   : > { %p2778_p5 = scmp.ge.s32.totalorder %s3261_s20, 1  ;;  %p295_p7 = scmp.lt.s32.totalorder %s3261_s20, 3 }
   0xe   : > { %p3388_p4 = por %p3937_p1, %p48_p0  ;;  %p3393_p6 = por %p288_p3, %p48_p0 }
   0xf   : > { %p3398_p8 = pnand %p2778_p5, %p295_p7  ;;  %s3267_s26 = smov [#allocation7]  }
  0x10   : > { %s3957_s23 = scalar_select %p3388_p4, 1, 0 }
  0x11   : > { %s3958_s24 = scalar_select %p3393_p6, 1, 0 }
  0x12   : > { %s313_s27 = sshll.u32 %s3267_s26, 4  ;;  %p2972_p9 = pneg %p3398_p8  ;;  %s3402_s27 = int_to_ptr.vmem [resolvable:$true] %s313_s27 }
  0x13   : > { %3959 = sst [smem:[#allocation15_spill]] %s3958_s24  ;;  %s3268_s29 = smov [#allocation9]  }
  0x14   : > { %p3409_p11 = pnand %p2972_p9, %p3937_p1  ;;  %s341_s30 = sshll.u32 %s3268_s29, 4  ;;  %s3413_s30 = int_to_ptr.vmem [resolvable:$true] %s341_s30 }
  0x15   : > { %s3101_s14 = scalar_lea.hbm %s3928_s3, 2304 }
  0x16   : > { %p3102_p12 = scmp.ne.s32.totalorder %s3928_s3, %s3101_s14  ;;  %p3103_p13 = pneg %p3409_p11 }
  0x17   : > { %p3108_p5 = scmp.lt.u32.totalorder %s3101_s14, %s3928_s3 }
  0x18   : > { %p3104_p0 = pnand %p3103_p13, %p3102_p12 }
  0x1a   : > { %p3105_p3 = pneg %p3104_p0 }
  0x1c   : > { %p3110_p7 = pnand %p3108_p5, %p3105_p3 }
  0x1e   : > { %3113 = shalt.err (!%p3110_p7)
}
  0x1f   : > { %s3114_s29 = scalar_lea.vmem %s3402_s27, 2304  ;;  %p3122_p2 = scmp.lt.s32.totalorder %s3402_s27, %s3402_s27 }
  0x20   : > { %p3115_p9 = scmp.ne.s32.totalorder %s3402_s27, %s3114_s29  ;;  %p3123_p12 = scmp.lt.s32.totalorder %s3114_s29, %s3114_s29 }
  0x22   : > { %p3117_p10 = pnand %p3115_p9, %p3103_p13  ;;  %p3124_p0 = por %p3123_p12, %p3122_p2 }
  0x24   : > { %p3118_p1 = pneg %p3117_p10 }
  0x26   : > { %p3125_p6 = pnand %p3124_p0, %p3118_p1 }
  0x28   : > { %3128 = shalt.err (!%p3125_p6)
}
  0x29   : > { %s3269_s12 = smov 64   ;;  %s3270_s13 = smov 4  }
  0x2a   : > { %2975 = dma.hbm_to_vmem [thread:$0]  (!%p3409_p11), %s3928_s3, 2304, %s3402_s27, [#allocation8], %s3269_s12, %s3269_s12, %s3270_s13  }
  0x2b   : > { %s3129_s26 = scalar_lea.hbm %s3934_s9, 1152 }
  0x2c   : > { %p3130_p2 = scmp.ne.s32.totalorder %s3934_s9, %s3129_s26  ;;  %p3136_p10 = scmp.lt.u32.totalorder %s3129_s26, %s3934_s9 }
  0x2e   : > { %p3132_p1 = pnand %p3130_p2, %p3103_p13 }
  0x30   : > { %p3133_p6 = pneg %p3132_p1 }
  0x32   : > { %p3138_p3 = pnand %p3136_p10, %p3133_p6 }
  0x34   : > { %3141 = shalt.err (!%p3138_p3)
}
  0x35   : > { %s3142_s27 = scalar_lea.vmem %s3413_s30, 1152  ;;  %p3150_p12 = scmp.lt.s32.totalorder %s3413_s30, %s3413_s30 }
  0x36   : > { %p3143_p5 = scmp.ne.s32.totalorder %s3413_s30, %s3142_s27  ;;  %p3151_p0 = scmp.lt.s32.totalorder %s3142_s27, %s3142_s27 }
  0x38   : > { %p3145_p7 = pnand %p3143_p5, %p3103_p13  ;;  %p3152_p2 = por %p3151_p0, %p3150_p12 }
  0x3a   : > { %p3146_p9 = pneg %p3145_p7 }
  0x3c   : > { %p3153_p1 = pnand %p3152_p2, %p3146_p9 }
  0x3e   : > { %3156 = shalt.err (!%p3153_p1)
}
  0x3f   : > { %2978 = dma.hbm_to_vmem [thread:$0]  (!%p3409_p11), %s3934_s9, 1152, %s3413_s30, [#allocation8], %s3269_s12, %s3269_s12, %s3270_s13  }
  0x40   : > { %s3468_s24 = sadd.s32 1, %s3261_s20   ;;  %s35_s28 = sadd.s32 1, %s3257_s19 }
  0x41   : > { %s32_s14 = ssub.s32 %s3261_s20, %s3468_s24  ;;  %p42_p13 = scmp.ne.s32.totalorder %s3257_s19, %s3253_s18 }
  0x42   : > { %p33_p6 = scmp.eq.s32.totalorder %s32_s14, 0  ;;  %p43_p10 = scmp.eq.s32.totalorder %s3261_s20, 0 }
  0x43   : > { %p3962_p3 = scmp.eq.s32.totalorder %s3379_s21, 1  ;;  %p2989_p7 = scmp.lt.s32.totalorder %s3261_s20, 2 }
  0x44   : > { %s3484_s16 = scalar_select %p33_p6, %s3257_s19, %s35_s28  }
  0x45   : > { %p3478_p5 = por %p3962_p3, %p42_p13  ;;  %p44_p9 = por %p43_p10, %p42_p13 }
  0x46   : > { %s358_s22 = sand.u32 1, %s3257_s19   ;;  %s2863_s30 = sshll.u32 %s3261_s20, 9 }
  0x47   : > { %s3963_s15 = scalar_select %p3478_p5, 1, 0 }
  0x48   : > { %s2782_s26 = sshll.u32 %s358_s22, 5  ;;  %s3964_s0 = sld [smem:[#allocation16_spill]] }
  0x49   : > { %s362_s27 = scalar_lea.vmem [#allocation4], %s2782_s26  ;;  %p3495_p11 = pnand %p2989_p7, %p44_p9 }
  0x4a   : > { %s369_s11 = sshll.u32 %s362_s27, 4  ;;  %s3499_s28 = scalar_lea.sflag [#allocation5], %s358_s22  ;;  %s3493_s11 = int_to_ptr.vmem [resolvable:$true] %s369_s11 }
  0x4b   : > { %p3159_p0 = pneg %p3495_p11 }
  0x4e   : > { %s3491_s29 = scalar_lea.hbm %s3964_s0, %s2863_s30  ;;  %s3162_s12 = scalar_lea.hbm %s3964_s0, 1024 }
  0x4f   : > { %s3157_s14 = scalar_lea.hbm %s3491_s29, 512  ;;  %p3163_p13 = scmp.lt.u32.totalorder %s3491_s29, %s3964_s0 }
  0x50   : > { %p3158_p12 = scmp.ne.s32.totalorder %s3491_s29, %s3157_s14  ;;  %p3164_p6 = scmp.lt.u32.totalorder %s3162_s12, %s3157_s14 }
  0x51   : > { %p3166_p3 = scmp.lt.u32.totalorder %s3157_s14, %s3491_s29 }
  0x52   : > { %p3160_p2 = pnand %p3159_p0, %p3158_p12  ;;  %p3165_p10 = por %p3164_p6, %p3163_p13 }
  0x54   : > { %p3161_p1 = pneg %p3160_p2  ;;  %p3167_p7 = por %p3166_p3, %p3165_p10 }
  0x56   : > { %p3168_p9 = pnand %p3167_p7, %p3161_p1 }
  0x58   : > { %3171 = shalt.err (!%p3168_p9)
}
  0x59   : > { %s3172_s22 = scalar_lea.vmem %s3493_s11, 512  ;;  %s3271_s26 = smov [#allocation4]  }
  0x5a   : > { %p3173_p12 = scmp.ne.s32.totalorder %s3493_s11, %s3172_s22  ;;  %s3177_s30 = sshll.u32 %s3271_s26, 4  ;;  %s3178_s30 = int_to_ptr.vmem [resolvable:$false] %s3177_s30 }
  0x5b   : > { %s3179_s13 = scalar_lea.vmem %s3178_s30, 1024  ;;  %p3180_p4 = scmp.lt.s32.totalorder %s3493_s11, %s3178_s30 }
  0x5c   : > { %p3175_p2 = pnand %p3173_p12, %p3159_p0  ;;  %p3181_p13 = scmp.lt.s32.totalorder %s3179_s13, %s3172_s22 }
  0x5e   : > { %p3176_p5 = pneg %p3175_p2  ;;  %p3182_p6 = por %p3181_p13, %p3180_p4 }
  0x60   : > { %p3183_p10 = pnand %p3182_p6, %p3176_p5 }
  0x62   : > { %3186 = shalt.err (!%p3183_p10)
}
  0x63   : > { %s3272_s14 = smov 256   ;;  %s3273_s12 = smov 16  }
  0x64   : > { %2982 = dma.hbm_to_vmem [thread:$0]  (!%p3495_p11), %s3491_s29, 512, %s3493_s11, %s3499_s28, %s3272_s14, %s3272_s14, %s3273_s12  }
  0x65   : > { %381 = sbr.rel (%p3398_p8) target bundleno = 2068 (0x814), region = 64  ;;  %s3530_s27 = sand.u32 (!%p3398_p8), 1, %s3253_s18  }
  0x66   : > { %s2786_s22 = sshll.u32 (!%p3398_p8), %s3530_s27, 5  ;;  %s384_s26 = scalar_lea.sflag (!%p3398_p8), [#allocation5], %s3530_s27 }
  0x67   : > { %s3536_s30 = scalar_lea.vmem (!%p3398_p8), [#allocation4], %s2786_s22  ;;  %p3966_p4 = scmp.ne.s32.totalorder (!%p3398_p8), %s3957_s23, 0 }
  0x6c   : > { %3236 = dma.done.wait (%p3966_p4), %s384_s26, 512  }
  0x6d   : > { %3238 = vsyncadd (%p3966_p4), %s384_s26, 4294966784  ;;  %p3967_p5 = scmp.eq.s32.totalorder %s3379_s21, 0 }
  0x6f   : > { %3240 = dma.done.wait (%p3967_p5), [#allocation8], 3456   ;;  %p3968_p8 = pmov %p3967_p5 }
  0x70   : > { %v435_v0 = vlaneseq  ;;  %v3274_v1 = vmov 0.0   ;;  %v482_v8 = vld [vmem:[%s3536_s30] sm:$0xff]  ;;  %v483_v9 = vld [vmem:[%s3536_s30 + $0x8] sm:$0xff]  ;;  %v484_v10 = vld [vmem:[%s3536_s30 + $0x10] sm:$0xff]  ;;  %s3560_s23 = scalar_lea.vmem [#allocation10], %s2786_s22  ;;  %s3562_s25 = smov 0  }
  0x71   : > { %3242 = vsyncadd (%p3968_p8), [#allocation8], 4294963840  ;;  %474 = vst [vmem:[#allocation2] sm:$0xff] %v3274_v1  ;;  %v485_v11 = vld [vmem:[%s3536_s30 + $0x18] sm:$0xff] }
  0x72   : > { %477 = vst [vmem:[#allocation2 + $0x18] sm:$0xff] %v3274_v1  ;;  %478 = vst [vmem:[#allocation2 + $0x20] sm:$0xff] %v3274_v1  ;;  %v436_v2 = vand.u32 127, %v435_v0 }
  0x73   : > { %481 = vst [vmem:[#allocation2 + $0x38] sm:$0xff] %v3274_v1  ;;  %486 = vst [vmem:[#allocation3] sm:$0xff] %v482_v8 }
  0x74   : > { %v437_v3 = vadd.s32 128, %v436_v2  ;;  %v442_v4 = vand.u32 15, %v436_v2  ;;  %487 = vst [vmem:[#allocation3 + $0x8] sm:$0xff] %v483_v9  ;;  %488 = vst [vmem:[#allocation3 + $0x10] sm:$0xff] %v484_v10 }
  0x75   : > { %489 = vst [vmem:[#allocation3 + $0x18] sm:$0xff] %v485_v11 }
  0x76   : > { %v449_v5 = vand.u32 15, %v437_v3  ;;  %vm462_vm0 = vcmp.ne.s32.totalorder %v442_v4, 0  ;;  %vm468_vm1 = vcmp.ne.s32.totalorder %v442_v4, 15 }
  0x77   : > { %v3546_v6 = vsel %vm462_vm0, 1.0, %v3274_v1  ;;  %v3548_v7 = vsel %vm468_vm1, 1.0, %v3274_v1 }
  0x78   : > { %vm463_vm2 = vcmp.ne.s32.totalorder %v449_v5, 0  ;;  %vm469_vm3 = vcmp.ne.s32.totalorder %v449_v5, 15 }
  0x79   : > { %v3554_v12 = vsel %vm463_vm2, 1.0, %v3274_v1  ;;  %v3556_v13 = vsel %vm469_vm3, 1.0, %v3274_v1 }
  0x7a LB: >> { %v529_v14 = vld [vmem:[#allocation2] sm:$0xff]  ;;  %v3275_v23 = vmov 0   ;;  %s3276_s29 = smov 1   ;;  %s2864_s11 = smul.u32 72, %s3265_s25  ;;  %v781_v24 = vld [vmem:[#allocation2 + $0x18] sm:$0xff]  ;;  %vm557_vm4 = vcmask 130048   ;;  %s3265_s25 = sphi %s3562_s25, %s495_s25  }
  0x7b   : >> { %v532_v15 = vld [vmem:[#allocation2 + $0x20] sm:$0xff]  ;;  %v3571_v18 = vld [vmem:[#allocation3 + $0x10] sm:$0xff]  ;;  %v3573_v19 = vld [vmem:[#allocation3 + $0x8] sm:$0xff]  ;;  %593 = vmatprep.mubr.bf16.mxu0 %v3275_v23  ;;  %706 = vmatprep.mubr.bf16.mxu1 %v3275_v23  ;;  %s3951_s17 = smov 17   ;;  %s3969_s1 = sld [smem:[#allocation17_spill]]  ;;  %vm552_vm5 = vcmask 7168  }
  0x7c   : >> { %v3567_v16 = vld [vmem:[#allocation3] sm:$0xff]  ;;  %v3569_v17 = vpack.c.bf16 %v532_v15, %v529_v14  ;;  %v3575_v20 = vld [vmem:[#allocation3 + $0x18] sm:$0xff]  ;;  %3062 = vset.pattern.permute.xlu0 %v3275_v23  ;;  %3063 = vset.pattern.permute.xlu1 %v3275_v23  ;;  %s3949_s12 = smov 127   ;;  %s3607_s22 = scalar_lea.vmem [#allocation7], %s2864_s11  ;;  %vm615_vm6 = vcmask 138240   ;;  %vm802_vm7 = vcmask 1039360  }
  0x7d   : >> { %v536_v21 = vpack.c.bf16 %v3571_v18, %v3567_v16  ;;  %v537_v22 = vpack.c.bf16 %v3575_v20, %v3573_v19  ;;  %v784_v25 = vld [vmem:[#allocation2 + $0x38] sm:$0xff]  ;;  %s3943_s26 = smov 15   ;;  %s3945_s28 = smov 16   ;;  %vm864_vm8 = vcmask 121856   ;;  %vm926_vm9 = vcmask 924672  }
  0x7e   : >> { %546 = vrot.lane.b32.xlu1 %v3569_v17, %s3276_s29  ;;  %v3598_v26 = vpack.c.bf16 %v784_v25, %v781_v24  ;;  %s3947_s13 = smov 113   ;;  %vm992_vm10 = vcmask 916480   ;;  %vm1058_vm11 = vcmask 908288   ;;  %vm3285_vm12 = vmmov 0  }
  0x7f   : >> { %548 = vrot.lane.b32.xlu0 %v536_v21, %s3276_s29  ;;  %674 = vmatprep.subr.bf16.mxu1 %v537_v22  ;;  %vm1872_vm13 = vcmask 31744   ;;  %vm1879_vm14 = vcmask 1043456  }
  0x80   : >> { %675 = vmatpush1.bf16.msra.mxu1 %v536_v21 }
  0x81   : >> { %s3594_s14 = scalar_lea.vmem %s3969_s1, %s2864_s11  ;;  %s3282_s11 = smov 112  }
  0x82   : >> { %611 = vrot.lane.b32.xlu1 %v536_v21, %s3951_s17  ;;  %v3066_v27 = vld [vmem:[%s3594_s14 + $0x20] sm:$0xff]   ;;  %v3064_v36 = vld [vmem:[%s3594_s14 + $0x18] sm:$0xff]   ;;  %v3067_v54 = vld [vmem:[%s3594_s14 + $0x28] sm:$0xff]  }
  0x83   : >> { %550 = vrot.lane.b32.xlu0 %v537_v22, %s3276_s29  ;;  %2801 = vmatmul.mubr.msk.bf16.vlgmr.msra.gmra.mrb[0].mxu1 %vm557_vm4, %v3066_v27  ;;  %v3065_v46 = vld [vmem:[%s3594_s14] sm:$0xff]   ;;  %v3068_v58 = vld [vmem:[%s3594_s14 + $0x8] sm:$0xff]   ;;  %v3069_v2 = vld [vmem:[%s3594_s14 + $0x10] sm:$0xff]  }
  0x84   : >> { %768 = vmatprep.mubr.bf16.mxu1 %v3275_v23  ;;  %v3070_v14 = vld [vmem:[%s3594_s14 + $0x38] sm:$0xff]   ;;  %v3071_v15 = vld [vmem:[%s3594_s14 + $0x30] sm:$0xff]  }
  0x86   : >> { %609 = vrot.lane.b32.xlu1 %v3569_v17, %s3951_s17 }
  0x87   : >> { %613 = vrot.lane.b32.xlu0 %v537_v22, %s3951_s17 }
  0x8a   : >> { %800 = vrot.lane.b32.xlu1 %v3598_v26, %s3949_s12 }
  0x8b   : >> { %798 = vrot.lane.b32.xlu0 %v537_v22, %s3949_s12 }
  0x8e   : >> { %860 = vrot.lane.b32.xlu1 %v536_v21, %s3943_s26 }
  0x8f   : >> { %796 = vrot.lane.b32.xlu0 %v536_v21, %s3949_s12  ;;  %s3972_s12 = smov 16  }
  0x92   : >> { %858 = vrot.lane.b32.xlu1 %v3569_v17, %s3943_s26 }
  0x93   : >> { %862 = vrot.lane.b32.xlu0 %v537_v22, %s3943_s26  ;;  %s3283_s26 = smov 111  }
  0x96   : >> { %726 = vrot.lane.b32.xlu1 %v537_v22, %s3945_s28 }
  0x97   : >> { %724 = vrot.lane.b32.xlu0 %v536_v21, %s3945_s28 }
  0x9a   : >> { %922 = vrot.lane.b32.xlu1 %v537_v22, %s3947_s13 }
  0x9b   : >> { %722 = vrot.lane.b32.xlu0 %v3569_v17, %s3945_s28  ;;  %s3631_s28 = sshll.u32 %s3265_s25, 4 }
  0x9c   : >> { %s522_s17 = scalar_lea.vmem %s3927_s2, %s3631_s28 }
  0x9d   : >> { %v523_v28 = vld [vmem:[%s522_s17] sm:$0xff]  ;;  %v524_v29 = vld [vmem:[%s522_s17 + $0x8] sm:$0xff]  ;;  %s3970_s17 = smov 17  }
  0x9e   : >> { %920 = vrot.lane.b32.xlu1 %v536_v21, %s3947_s13 }
  0x9f   : >> { %924 = vrot.lane.b32.xlu0 %v3598_v26, %s3947_s13  ;;  %s3973_s13 = smov 15  }
  0xa2   : >> { %990 = vrot.lane.b32.xlu1 %v3598_v26, %s3282_s11 }
  0xa3   : >> { %988 = vrot.lane.b32.xlu0 %v537_v22, %s3282_s11 }
  0xa6   : >> { %1056 = vrot.lane.b32.xlu1 %v3598_v26, %s3283_s26 }
  0xa7   : >> { %1054 = vrot.lane.b32.xlu0 %v537_v22, %s3283_s26  ;;  %v3072_v22 = vld [vmem:[%s3594_s14 + $0x40] sm:$0xff]   ;;  %s3971_s14 = smov 127  }
  0xaa   : >> { %1052 = vrot.lane.b32.xlu1 %v536_v21, %s3283_s26 }
  0xab   : >> { %986 = vrot.lane.b32.xlu0 %v536_v21, %s3282_s11 }
  0xae   : >> { %1136 = vperm.xlu1 %3063, %v524_v29  }
  0xaf   : >> { %1131 = vperm.xlu0 %3062, %v523_v28  }
  0xf0   : >> { %v547_v30 = vpop.permute.xlu1 %546 }
  0xf1   : >> { %v549_v31 = vpop.permute.xlu0 %548 }
  0xf2   : >> { %v553_v35 = vsel %vm552_vm5, %v547_v30, %v549_v31 }
  0xf4   : >> { %v612_v32 = vpop.permute.xlu1 %611 }
  0xf5   : >> { %v551_v33 = vpop.permute.xlu0 %550 }
  0xf6   : >> { %v554_v34 = vsel %vm552_vm5, %v549_v31, %v551_v33 }
  0xf7   : >> { %561 = vmatprep.subr.bf16.mxu0 %v554_v34 }
  0xf8   : >> { %562 = vmatpush1.bf16.msra.mxu0 %v553_v35  ;;  %v610_v37 = vpop.permute.xlu1 %609 }
  0xf9   : >> { %v614_v38 = vpop.permute.xlu0 %613  ;;  %v616_v39 = vsel %vm615_vm6, %v610_v37, %v612_v32 }
  0xfa   : >> { %v617_v40 = vsel %vm615_vm6, %v612_v32, %v614_v38 }
  0xfb   : >> { %2797 = vmatmul.mubr.msk.bf16.vlgmr.msra.gmra.mrb[0].mxu0 %vm557_vm4, %v3064_v36  ;;  %623 = vmatprep.subr.bf16.mxu0 %v617_v40 }
  0xfc   : >> { %624 = vmatpush1.bf16.msra.mxu0 %v616_v39  ;;  %v801_v41 = vpop.permute.xlu1 %800  ;;  %655 = vmatprep.mubr.bf16.mxu0 %v3275_v23 }
  0xfd   : >> { %v799_v42 = vpop.permute.xlu0 %798 }
  0xfe   : >> { %v804_v43 = vsel %vm802_vm7, %v799_v42, %v801_v41 }
  0xff   : >> { %810 = vmatprep.subr.bf16.mxu0 %v804_v43 }
 0x100   : >> { %v861_v44 = vpop.permute.xlu1 %860 }
 0x101   : >> { %v797_v45 = vpop.permute.xlu0 %796 }
 0x102   : >> { %v803_v48 = vsel %vm802_vm7, %v797_v45, %v799_v42 }
 0x104   : >> { %v859_v47 = vpop.permute.xlu1 %858 }
 0x105   : >> { %v863_v49 = vpop.permute.xlu0 %862  ;;  %v865_v59 = vsel %vm864_vm8, %v859_v47, %v861_v44 }
 0x106   : >> { %v866_v50 = vsel %vm864_vm8, %v861_v44, %v863_v49 }
 0x107   : >> { %2799 = vmatmul.mubr.msk.bf16.vlgmr.msra.gmra.mrb[0].mxu0 %vm557_vm4, %v3065_v46 }
 0x108   : >> { %811 = vmatpush1.bf16.msra.mxu0 %v803_v48  ;;  %v727_v51 = vpop.permute.xlu1 %726  ;;  %842 = vmatprep.mubr.bf16.mxu0 %v3275_v23 }
 0x109   : >> { %v725_v52 = vpop.permute.xlu0 %724  ;;  %872 = vmatprep.subr.bf16.mxu0 %v866_v50 }
 0x10a   : >> { %v730_v53 = vsel %vm557_vm4, %v725_v52, %v727_v51 }
 0x10b   : >> { %736 = vmatprep.subr.bf16.mxu1 %v730_v53 }
 0x10c   : >> { %v923_v55 = vpop.permute.xlu1 %922 }
 0x10d   : >> { %v723_v56 = vpop.permute.xlu0 %722 }
 0x10e   : >> { %v729_v57 = vsel %vm557_vm4, %v723_v56, %v725_v52 }
 0x10f   : >> { %2805 = vmatmul.mubr.msk.bf16.vlgmr.msra.gmra.mrb[4].mxu0 %vm557_vm4, %v3067_v54  ;;  %737 = vmatpush1.bf16.msra.mxu1 %v729_v57 }
 0x110   : >> { %873 = vmatpush1.bf16.msra.mxu0 %v865_v59  ;;  %v921_v60 = vpop.permute.xlu1 %920  ;;  %904 = vmatprep.mubr.bf16.mxu0 %v3275_v23 }
 0x111   : >> { %v925_v61 = vpop.permute.xlu0 %924  ;;  %v927_v8 = vsel %vm926_vm9, %v921_v60, %v923_v55 }
 0x112   : >> { %2803 = vmatmul.mubr.msk.bf16.vlgmr.msra.gmra.mrb[0].mxu1 %vm557_vm4, %v3068_v58  ;;  %v928_v62 = vsel %vm926_vm9, %v923_v55, %v925_v61 }
 0x113   : >> { %934 = vmatprep.subr.bf16.mxu0 %v928_v62  ;;  %1032 = vmatprep.mubr.bf16.mxu1 %v3275_v23 }
 0x114   : >> { %v991_v63 = vpop.permute.xlu1 %990 }
 0x115   : >> { %v989_v0 = vpop.permute.xlu0 %988 }
 0x116   : >> { %v994_v1 = vsel %vm992_vm10, %v989_v0, %v991_v63 }
 0x117   : >> { %1000 = vmatprep.subr.bf16.mxu1 %v994_v1 }
 0x118   : >> { %v1057_v3 = vpop.permute.xlu1 %1056 }
 0x119   : >> { %v1055_v4 = vpop.permute.xlu0 %1054 }
 0x11a   : >> { %v1060_v5 = vsel %vm1058_vm11, %v1055_v4, %v1057_v3 }
 0x11b   : >> { %2807 = vmatmul.mubr.msk.bf16.vlgmr.msra.gmra.mrb[4].mxu0 %vm557_vm4, %v3069_v2 }
 0x11c   : >> { %935 = vmatpush1.bf16.msra.mxu0 %v927_v8  ;;  %966 = vmatprep.mubr.bf16.mxu0 %v3275_v23  ;;  %v1053_v11 = vpop.permute.xlu1 %1052 }
 0x11d   : >> { %v987_v9 = vpop.permute.xlu0 %986  ;;  %1066 = vmatprep.subr.bf16.mxu0 %v1060_v5  ;;  %v1059_v21 = vsel %vm1058_vm11, %v1053_v11, %v1055_v4 }
 0x11e   : >> { %v993_v10 = vsel %vm992_vm10, %v987_v9, %v989_v0  ;;  %v3073_v9 = vld [vmem:[%s3607_s22 + $0x18] sm:$0xff]  }
 0x11f   : >> { %1001 = vmatpush1.bf16.msra.mxu1 %v993_v10 }
 0x122   : >> { %2811 = vmatmul.mubr.msk.bf16.vlgmr.msra.gmra.mrb[0].mxu1 %vm557_vm4, %v3070_v14 }
 0x123   : >> { %2809 = vmatmul.mubr.msk.bf16.vlgmr.msra.gmra.mrb[0].mxu0 %vm557_vm4, %v3071_v15  ;;  %1236 = vmatprep.mubr.bf16.mxu1 %v3275_v23 }
 0x124   : >> { %1067 = vmatpush1.bf16.msra.mxu0 %v1059_v21  ;;  %1098 = vmatprep.mubr.bf16.mxu0 %v3275_v23 }
 0x12b   : >> { %2813 = vmatmul.mubr.msk.bf16.vlgmr.msra.gmra.mrb[4].mxu0 %vm557_vm4, %v3072_v22 }
 0x12c   : >> { %1482 = vmatprep.mubr.bf16.mxu0 %v3275_v23 }
 0x12d   : >> { %v1137_v52 = vpop.permute.xlu1 %1136 }
 0x12e   : >> { %v1132_v46 = vpop.permute.xlu0 %1131 }
 0x1f5   : >> { %v1034_v24 = vpop.f32.mrb[0].mxu1 }
 0x1f6   : >> { %v968_v25 = vpop.f32.mrb[0].mxu0  ;;  %v1036_v27 = vpop.f32.mrb[1].mxu1 }
 0x1f7   : >> { %v1113_v28 = vmul.f32 %v3546_v6, %v968_v25  ;;  %v970_v29 = vpop.f32.mrb[1].mxu0  ;;  %v1038_v30 = vpop.f32.mrb[2].mxu1 }
 0x1f8   : >> { %v1114_v31 = vmul.f32 %v3554_v12, %v970_v29  ;;  %v972_v32 = vpop.f32.mrb[2].mxu0  ;;  %v1040_v33 = vpop.f32.mrb[3].mxu1  ;;  %v3074_v29 = vld [vmem:[%s3607_s22] sm:$0xff]  }
 0x1f9   : >> { %v1117_v34 = vadd.f32 %v1113_v28, %v1034_v24  ;;  %v1115_v35 = vmul.f32 %v3546_v6, %v972_v32  ;;  %v974_v36 = vpop.f32.mrb[3].mxu0 }
 0x1fa   : >> { %v1118_v37 = vadd.f32 %v1114_v31, %v1036_v27  ;;  %v1116_v38 = vmul.f32 %v3554_v12, %v974_v36  ;;  %v3076_v36 = vld [vmem:[%s3607_s22 + $0x20] sm:$0xff]  }
 0x1fb   : >> { %v1119_v39 = vadd.f32 %v1115_v35, %v1038_v30  ;;  %v3075_v30 = vld [vmem:[%s3607_s22 + $0x28] sm:$0xff]  }
 0x1fc   : >> { %v1120_v40 = vadd.f32 %v1116_v38, %v1040_v33 }
 0x1fe   : >> { %v1100_v41 = vpop.f32.mrb[4].mxu0 }
 0x1ff   : >> { %v1121_v42 = vmul.f32 %v3548_v7, %v1100_v41  ;;  %v1102_v43 = vpop.f32.mrb[5].mxu0 }
 0x200   : >> { %v1122_v44 = vmul.f32 %v3556_v13, %v1102_v43  ;;  %v1104_v45 = vpop.f32.mrb[6].mxu0 }
 0x201   : >> { %v1125_v47 = vadd.f32 %v1121_v42, %v1117_v34  ;;  %v1123_v48 = vmul.f32 %v3548_v7, %v1104_v45  ;;  %v1106_v49 = vpop.f32.mrb[7].mxu0  ;;  %v3077_v42 = vld [vmem:[%s3607_s22 + $0x10] sm:$0xff]  }
 0x202   : >> { %v1126_v50 = vadd.f32 %v1122_v44, %v1118_v37  ;;  %v1124_v51 = vmul.f32 %v3556_v13, %v1106_v49 }
 0x203   : >> { %v1127_v53 = vadd.f32 %v1123_v48, %v1119_v39  ;;  %v1139_v54 = vadd.f32 %v1132_v46, %v1125_v47  ;;  %v3078_v48 = vld [vmem:[%s3607_s22 + $0x8] sm:$0xff]  }
 0x204   : >> { %v1128_v55 = vadd.f32 %v1124_v51, %v1120_v40  ;;  %v1140_v56 = vadd.f32 %v1132_v46, %v1126_v50 }
 0x205   : >> { %v1143_v57 = vmax.f32 %v1139_v54, 0.0  ;;  %v1141_v58 = vadd.f32 %v1137_v52, %v1127_v53 }
 0x206   : >> { %v1144_v59 = vmax.f32 %v1140_v56, 0.0  ;;  %v1142_v60 = vadd.f32 %v1137_v52, %v1128_v55  ;;  %v3079_v55 = vld [vmem:[%s3607_s22 + $0x30] sm:$0xff]  }
 0x207   : >> { %v1145_v61 = vmax.f32 %v1141_v58, 0.0  ;;  %v3080_v58 = vld [vmem:[%s3607_s22 + $0x40] sm:$0xff]  }
 0x208   : >> { %v1146_v62 = vmax.f32 %v1142_v60, 0.0  ;;  %v3081_v60 = vld [vmem:[%s3607_s22 + $0x38] sm:$0xff]   ;;  %s2833_s22 = sshll.u32 %s3265_s25, 2  ;;  %s495_s25 = sadd.s32 1, %s3265_s25  }
 0x209   : >> { %v1181_v63 = vpack.c.bf16 %v1145_v61, %v1143_v57  ;;  %s1790_s1 = scalar_lea.vmem %s3931_s6, %s2833_s22  ;;  %p492_p11 = scmp.ge.s32.totalorder %s495_s25, 2  }
 0x20a   : >> { %v1182_v0 = vpack.c.bf16 %v1146_v62, %v1144_v59  ;;  %s3288_s0 = smov (%p492_p11), 17   ;;  %s3290_s25 = smov (%p492_p11), 127  }
 0x20b   : >> { %1193 = vrot.lane.b32.xlu1 %v1181_v63, %s3276_s29  ;;  %p3976_p1 = scmp.ne.s32.totalorder (%p492_p11), %s3963_s15, 0 }
 0x20c   : >> { %1195 = vrot.lane.b32.xlu0 %v1182_v0, %s3276_s29 }
 0x20f   : >> { %1191 = vrot.lane.b32.xlu1 %v3569_v17, %s3276_s29  ;;  %s3974_s29 = smov 113  }
 0x210   : >> { %1254 = vrot.lane.b32.xlu0 %v1181_v63, %s3970_s17 }
 0x213   : >> { %1256 = vrot.lane.b32.xlu1 %v1182_v0, %s3970_s17 }
 0x214   : >> { %1252 = vrot.lane.b32.xlu0 %v3569_v17, %s3970_s17  ;;  %s3294_s17 = smov (%p492_p11), 112  }
 0x217   : >> { %1437 = vrot.lane.b32.xlu1 %v1181_v63, %s3971_s14 }
 0x218   : >> { %1441 = vrot.lane.b32.xlu0 %v3598_v26, %s3971_s14 }
 0x21b   : >> { %1439 = vrot.lane.b32.xlu1 %v1182_v0, %s3971_s14  ;;  %s1866_s14 = scalar_lea.vmem %s3932_s7, %s3631_s28 }
 0x21c   : >> { %1366 = vrot.lane.b32.xlu0 %v1181_v63, %s3972_s12 }
 0x21f   : >> { %1500 = vrot.lane.b32.xlu1 %v1181_v63, %s3973_s13 }
 0x220   : >> { %1364 = vrot.lane.b32.xlu0 %v3569_v17, %s3972_s12 }
 0x223   : >> { %1368 = vrot.lane.b32.xlu1 %v1182_v0, %s3972_s12  ;;  %s1167_s12 = scalar_lea.vmem %s3929_s4, %s3631_s28 }
 0x224   : >> { %1559 = vrot.lane.b32.xlu0 %v1181_v63, %s3974_s29  ;;  %v1169_v1 = vld [vmem:[%s1167_s12 + $0x8] sm:$0xff] }
 0x227   : >> { %1498 = vrot.lane.b32.xlu1 %v3569_v17, %s3973_s13  ;;  %v1168_v17 = vld [vmem:[%s1167_s12] sm:$0xff] }
 0x228   : >> { %1502 = vrot.lane.b32.xlu0 %v1182_v0, %s3973_s13  ;;  %s1788_s13 = scalar_lea.vmem %s3930_s5, %s2833_s22  ;;  %s3292_s22 = smov (%p492_p11), 16  }
 0x22b   : >> { %1563 = vrot.lane.b32.xlu1 %v3598_v26, %s3974_s29 }
 0x22c   : >> { %1561 = vrot.lane.b32.xlu0 %v1182_v0, %s3974_s29  ;;  %s3293_s29 = smov (%p492_p11), 113  }
 0x22f   : >> { %1626 = vrot.lane.b32.xlu1 %v1182_v0, %s3282_s11 }
 0x230   : >> { %1628 = vrot.lane.b32.xlu0 %v3598_v26, %s3282_s11 }
 0x233   : >> { %1691 = vrot.lane.b32.xlu1 %v1182_v0, %s3283_s26 }
 0x234   : >> { %1693 = vrot.lane.b32.xlu0 %v3598_v26, %s3283_s26 }
 0x237   : >> { %1624 = vrot.lane.b32.xlu1 %v1181_v63, %s3282_s11 }
 0x238   : >> { %1689 = vrot.lane.b32.xlu0 %v1181_v63, %s3283_s26 }
 0x23b   : >> { %1767 = vperm.xlu1 %3063, %v1168_v17  }
 0x23c   : >> { %1772 = vperm.xlu0 %3062, %v1169_v1  }
 0x27d   : >> { %v1194_v2 = vpop.permute.xlu1 %1193 }
 0x27e   : >> { %v1196_v3 = vpop.permute.xlu0 %1195 }
 0x27f   : >> { %v1198_v4 = vsel %vm552_vm5, %v1194_v2, %v1196_v3 }
 0x280   : >> { %1204 = vmatprep.subr.bf16.mxu1 %v1198_v4 }
 0x281   : >> { %v1192_v5 = vpop.permute.xlu1 %1191 }
 0x282   : >> { %v1197_v26 = vsel %vm552_vm5, %v1192_v5, %v1194_v2  ;;  %v1255_v8 = vpop.permute.xlu0 %1254 }
 0x283   : >> { %1205 = vmatpush1.bf16.msra.mxu1 %v1197_v26 }
 0x285   : >> { %v1257_v10 = vpop.permute.xlu1 %1256 }
 0x286   : >> { %2816 = vmatmul.mubr.msk.bf16.vlgmr.msra.gmra.mrb[4].mxu1 %vm557_vm4, %v3073_v9  ;;  %v1253_v11 = vpop.permute.xlu0 %1252  ;;  %v1259_v14 = vsel %vm615_vm6, %v1255_v8, %v1257_v10 }
 0x287   : >> { %v1258_v15 = vsel %vm615_vm6, %v1253_v11, %v1255_v8  ;;  %1265 = vmatprep.subr.bf16.mxu1 %v1259_v14  ;;  %1297 = vmatprep.mubr.bf16.mxu1 %v3275_v23 }
 0x288   : >> { %1266 = vmatpush1.bf16.msra.mxu1 %v1258_v15 }
 0x289   : >> { %v1438_v21 = vpop.permute.xlu1 %1437  ;;  %1316 = vmatprep.subr.bf16.mxu1 %v1182_v0 }
 0x28a   : >> { %v1442_v22 = vpop.permute.xlu0 %1441 }
 0x28d   : >> { %v1440_v24 = vpop.permute.xlu1 %1439 }
 0x28e   : >> { %v1443_v25 = vsel %vm802_vm7, %v1438_v21, %v1440_v24  ;;  %v1367_v27 = vpop.permute.xlu0 %1366  ;;  %v1444_v28 = vsel %vm802_vm7, %v1440_v24, %v1442_v22 }
 0x28f   : >> { %1450 = vmatprep.subr.bf16.mxu0 %v1444_v28 }
 0x290   : >> { %1451 = vmatpush1.bf16.msra.mxu0 %v1443_v25 }
 0x291   : >> { %v1501_v31 = vpop.permute.xlu1 %1500 }
 0x292   : >> { %2818 = vmatmul.mubr.msk.bf16.vlgmr.msra.gmra.mrb[4].mxu1 %vm557_vm4, %v3074_v29  ;;  %v1365_v32 = vpop.permute.xlu0 %1364 }
 0x293   : >> { %1317 = vmatpush1.bf16.msra.mxu1 %v1181_v63  ;;  %2824 = vmatmul.mubr.msk.bf16.vlgmr.msra.gmra.mrb[8].mxu0 %vm557_vm4, %v3075_v30  ;;  %v1370_v38 = vsel %vm557_vm4, %v1365_v32, %v1367_v27 }
 0x294   : >> { %1348 = vmatprep.mubr.bf16.mxu1 %v3275_v23  ;;  %1543 = vmatprep.mubr.bf16.mxu0 %v3275_v23 }
 0x295   : >> { %v1369_v33 = vpop.permute.xlu1 %1368 }
 0x296   : >> { %v1560_v34 = vpop.permute.xlu0 %1559  ;;  %v1371_v35 = vsel %vm557_vm4, %v1367_v27, %v1369_v33 }
 0x297   : >> { %1377 = vmatprep.subr.bf16.mxu1 %v1371_v35 }
 0x299   : >> { %v1499_v37 = vpop.permute.xlu1 %1498 }
 0x29a   : >> { %2820 = vmatmul.mubr.msk.bf16.vlgmr.msra.gmra.mrb[8].mxu1 %vm557_vm4, %v3076_v36  ;;  %v1503_v39 = vpop.permute.xlu0 %1502  ;;  %v1504_v41 = vsel %vm864_vm8, %v1499_v37, %v1501_v31 }
 0x29b   : >> { %1378 = vmatpush1.bf16.msra.mxu1 %v1370_v38  ;;  %v1505_v40 = vsel %vm864_vm8, %v1501_v31, %v1503_v39  ;;  %1409 = vmatprep.mubr.bf16.mxu1 %v3275_v23 }
 0x29c   : >> { %1511 = vmatprep.subr.bf16.mxu0 %v1505_v40 }
 0x29d   : >> { %v1564_v43 = vpop.permute.xlu1 %1563  ;;  %1512 = vmatpush1.bf16.msra.mxu0 %v1504_v41  ;;  %v3284_v41 = vmov 0.0|0.0  }
 0x29e   : >> { %v1562_v44 = vpop.permute.xlu0 %1561 }
 0x29f   : >> { %v1566_v45 = vsel %vm926_vm9, %v1562_v44, %v1564_v43  ;;  %v1565_v50 = vsel %vm926_vm9, %v1560_v34, %v1562_v44 }
 0x2a0   : >> { %1572 = vmatprep.subr.bf16.mxu1 %v1566_v45  ;;  %2826 = vmatmul.mubr.msk.bf16.vlgmr.msra.gmra.mrb[8].mxu0 %vm557_vm4, %v3077_v42  ;;  %v3286_v42 = vmov 0.0  }
 0x2a1   : >> { %v1627_v46 = vpop.permute.xlu1 %1626  ;;  %1734 = vmatprep.mubr.bf16.mxu0 %v3275_v23 }
 0x2a2   : >> { %v1629_v47 = vpop.permute.xlu0 %1628 }
 0x2a3   : >> { %v1631_v52 = vsel %vm992_vm10, %v1627_v46, %v1629_v47 }
 0x2a5   : >> { %v1692_v49 = vpop.permute.xlu1 %1691 }
 0x2a6   : >> { %2822 = vmatmul.mubr.msk.bf16.vlgmr.msra.gmra.mrb[8].mxu1 %vm557_vm4, %v3078_v48  ;;  %v1694_v51 = vpop.permute.xlu0 %1693  ;;  %v1789_v48 = vld [vmem:[%s1788_s13] sm:$0xf]  ;;  %s1869_s13 = scalar_lea.vmem %s3933_s8, %s3631_s28  ;;  %s3291_s28 = smov (%p492_p11), 15  }
 0x2a7   : >> { %1573 = vmatpush1.bf16.msra.mxu1 %v1565_v50  ;;  %v1696_v53 = vsel %vm1058_vm11, %v1692_v49, %v1694_v51  ;;  %1604 = vmatprep.mubr.bf16.mxu1 %v3275_v23  ;;  %v1791_v50 = vld [vmem:[%s1790_s1] sm:$0xf]  ;;  %s3289_s1 = smov (%p492_p11), 1  }
 0x2a8   : >> { %1637 = vmatprep.subr.bf16.mxu1 %v1631_v52  ;;  %1702 = vmatprep.subr.bf16.mxu0 %v1696_v53 }
 0x2a9   : >> { %v1625_v56 = vpop.permute.xlu1 %1624 }
 0x2aa   : >> { %v1690_v54 = vpop.permute.xlu0 %1689  ;;  %v1630_v59 = vsel %vm992_vm10, %v1625_v56, %v1627_v46  ;;  %v1871_v56 = vld [vmem:[%s1869_s13 + $0x8] sm:$0xff] }
 0x2ab   : >> { %v1695_v57 = vsel %vm1058_vm11, %v1690_v54, %v1692_v49  ;;  %v1867_v49 = vld [vmem:[%s1866_s14] sm:$0xff] }
 0x2ac   : >> { %1703 = vmatpush1.bf16.msra.mxu0 %v1695_v57  ;;  %v1870_v57 = vld [vmem:[%s1869_s13] sm:$0xff] }
 0x2ad   : >> { %2885 = vmatprep.subr.bf16.mxu0 %v3284_v41  ;;  %v3092_v41 = vld [vmem:[#allocation9] sm:$0xff] (%p492_p11)  }
 0x2ae   : >> { %2828 = vmatmul.mubr.msk.bf16.vlgmr.msra.gmra.mrb[4].mxu1 %vm557_vm4, %v3079_v55  ;;  %v1868_v55 = vld [vmem:[%s1866_s14 + $0x8] sm:$0xff]  ;;  %s3295_s14 = smov (%p492_p11), 111  }
 0x2af   : >> { %1638 = vmatpush1.bf16.msra.mxu1 %v1630_v59  ;;  %2832 = vmatmul.mubr.msk.bf16.vlgmr.msra.gmra.mrb[8].mxu0 %vm557_vm4, %v3080_v58 }
 0x2b0   : >> { %1669 = vmatprep.mubr.bf16.mxu1 %v3275_v23  ;;  %2877 = vmatprep.mubr.msk.f32.mxu0 %vm3285_vm12, %v3286_v42 }
 0x2b6   : >> { %2830 = vmatmul.mubr.msk.bf16.vlgmr.msra.gmra.mrb[8].mxu1 %vm557_vm4, %v3081_v60 }
 0x2b7   : >> { %2882 = vmatprep.mubr.msk.f32.mxu1 %vm1872_vm13, %v1867_v49 }
 0x2ba   : >> { %v1768_v28 = vpop.permute.xlu1 %1767 }
 0x2bb   : >> { %v1773_v34 = vpop.permute.xlu0 %1772 }
 0x381   : >> { %v1606_v61 = vpop.f32.mrb[4].mxu1 }
 0x382   : >> { %v1608_v62 = vpop.f32.mrb[5].mxu1  ;;  %v1736_v63 = vpop.f32.mrb[8].mxu0  ;;  %v1749_v4 = vmul.f32 %v3546_v6, %v1606_v61 }
 0x383   : >> { %v1610_v0 = vpop.f32.mrb[6].mxu1  ;;  %v1738_v17 = vpop.f32.mrb[9].mxu0  ;;  %v1750_v5 = vmul.f32 %v3554_v12, %v1608_v62  ;;  %v1757_v8 = vmul.f32 %v3548_v7, %v1736_v63 }
 0x384   : >> { %v1612_v1 = vpop.f32.mrb[7].mxu1  ;;  %v1740_v2 = vpop.f32.mrb[10].mxu0  ;;  %v1751_v23 = vmul.f32 %v3546_v6, %v1610_v0  ;;  %v1758_v11 = vmul.f32 %v3556_v13, %v1738_v17 }
 0x385   : >> { %v1742_v3 = vpop.f32.mrb[11].mxu0  ;;  %v1752_v14 = vmul.f32 %v3554_v12, %v1612_v1  ;;  %v1759_v22 = vmul.f32 %v3548_v7, %v1740_v2 }
 0x386   : >> { %v1760_v29 = vmul.f32 %v3556_v13, %v1742_v3 }
 0x389   : >> { %v1671_v26 = vpop.f32.mrb[8].mxu1 }
 0x38a   : >> { %v1753_v9 = vadd.f32 %v1749_v4, %v1671_v26  ;;  %v1673_v10 = vpop.f32.mrb[9].mxu1 }
 0x38b   : >> { %v1754_v15 = vadd.f32 %v1750_v5, %v1673_v10  ;;  %v1675_v21 = vpop.f32.mrb[10].mxu1 }
 0x38c   : >> { %v1761_v24 = vadd.f32 %v1757_v8, %v1753_v9  ;;  %v1755_v25 = vadd.f32 %v1751_v23, %v1675_v21  ;;  %v1677_v27 = vpop.f32.mrb[11].mxu1 }
 0x38d   : >> { %v1762_v30 = vadd.f32 %v1758_v11, %v1754_v15  ;;  %v1756_v31 = vadd.f32 %v1752_v14, %v1677_v27 }
 0x38e   : >> { %v1763_v32 = vadd.f32 %v1759_v22, %v1755_v25  ;;  %v3770_v33 = vadd.f32 %v1768_v28, %v1761_v24  ;;  %v2024_v22 = vld [vmem:[#allocation2] sm:$0xff] (%p492_p11) }
 0x38f   : >> { %v1764_v35 = vadd.f32 %v1760_v29, %v1756_v31  ;;  %v3772_v36 = vadd.f32 %v1768_v28, %v1762_v30  ;;  %v2027_v24 = vld [vmem:[#allocation2 + $0x20] sm:$0xff] (%p492_p11)  ;;  %v2276_v30 = vld [vmem:[#allocation2 + $0x18] sm:$0xff] (%p492_p11) }
 0x390   : >> { %v1777_v37 = vadd.f32 %v1773_v34, %v1763_v32  ;;  %v2279_v31 = vld [vmem:[#allocation2 + $0x38] sm:$0xff] (%p492_p11) }
 0x391   : >> { %v1779_v38 = vadd.f32 %v3772_v36, %v3770_v33  ;;  %v1778_v39 = vadd.f32 %v1773_v34, %v1764_v35  ;;  %v2282_v32 = vpack.c.bf16 (%p492_p11), %v2279_v31, %v2276_v30  ;;  %v2018_v34 = vld [vmem:[%s3935_s10] sm:$0xff] (%p492_p11) }
 0x393   : >> { %1780 = vadd.xlane.f32.xlu1 %v1779_v38  ;;  %v1782_v40 = vadd.f32 %v1778_v39, %v1777_v37 }
 0x395   : >> { %1783 = vadd.xlane.f32.xlu0 %v1782_v40 }
 0x420   : >> { %v1781_v43 = vpop.xlane.xlu1 %1780 }
 0x421   : >> { %v1785_v45 = vmul.f32 0.00390625, %v1781_v43 }
 0x422   : >> { %v1784_v44 = vpop.xlane.xlu0 %1783 }
 0x423   : >> { %v1786_v46 = vmul.f32 0.00390625, %v1784_v44 }
 0x425   : >> { %v2886_v47 = vpack.c.bf16 %v1786_v46, %v1785_v45  ;;  %v3093_v46 = vld [vmem:[#allocation9 + $0x18] sm:$0xff] (%p492_p11)  }
 0x427   : >> { %2887 = vmatpush3.bf16.msra.mxu0 %v2886_v47 }
 0x42a   : >> { %2878 = vmatmul.mubr.msk.f32.vlgmr.msra.gmra.mrb[12].mxu0 %vm557_vm4, %v1789_v48 }
 0x4fd   : >> { %v1861_v51 = vpop.f32.mrb[12].mxu0 }
 0x4fe   : >> { %v1862_v52 = vadd.f32 %v1861_v51, %v1791_v50  ;;  %v2879_v53 = vpop.f32.mrb[13].mxu0 }
 0x4ff   : > { %v3094_v53 = vld [vmem:[#allocation9 + $0x28] sm:$0xff] (%p492_p11)  }
 0x500   : >> { %v1865_v54 = vmax.f32 %v1862_v52, 0.0 }
 0x502   : >> { %2880 = vmatprep.subr.msk.mxu1 %vm1879_vm14, %v1865_v54 }
 0x503   : >> { %2881 = vmatpush3.msk.msra.mxu1 %vm1879_vm14, %v1865_v54  ;;  %v3095_v54 = vld [vmem:[#allocation9 + $0x20] sm:$0xff] (%p492_p11)  }
 0x504   : >> { %2883 = vmatmul.mubr.msk.f32.vlgmr.msra.gmra.mrb[12].mxu1 %vm1872_vm13, %v1868_v55 }
 0x5d7   : >> { %v2884_v58 = vpop.f32.mrb[12].mxu1 }
 0x5d8   : >> { %v1955_v59 = vadd.f32 %v2884_v58, %v1871_v56  ;;  %v1949_v60 = vpop.f32.mrb[13].mxu1 }
 0x5d9   : >> { %v1950_v61 = vadd.f32 %v1949_v60, %v1870_v57 }
 0x5da   : >> { %v2839_v62 = vmul.f32 -1.442695, %v1955_v59 }
 0x5db   : >> { %v2838_v63 = vmul.f32 -1.442695, %v1950_v61 }
 0x5dc   : >> { %3082 = vpow2.f32 %v2839_v62 }
 0x5dd   : >> { %3084 = vpow2.f32 %v2838_v63 }
 0x5e6   : >> { %v3083_v0 = vpop.eup %3082 }
 0x5e7   : >> { %v3085_v17 = vpop.eup %3084  ;;  %v1965_v1 = vadd.f32 1.0, %v3083_v0 }
 0x5e8   : >> { %v1964_v2 = vadd.f32 1.0, %v3085_v17  ;;  %v3096_v17 = vld [vmem:[#allocation9 + $0x10] sm:$0xff] (%p492_p11)  }
 0x5e9   : >> { %3086 = vrcp.f32 %v1965_v1  ;;  %v3097_v1 = vld [vmem:[#allocation9 + $0x8] sm:$0xff] (%p492_p11)  }
 0x5ea   : >> { %3088 = vrcp.f32 %v1964_v2 }
 0x5f3   : >> { %v3087_v3 = vpop.eup %3086 }
 0x5f4   : >> { %v3089_v4 = vpop.eup %3088  ;;  %1977 = vperm.xlu1 %3063, %v3087_v3  }
 0x5f5   : >> { %1972 = vperm.xlu0 %3062, %v3089_v4  }
 0x673   : >> { %v1978_v5 = vpop.permute.xlu1 %1977  ;;  %494 = sbr.rel (!%p492_p11) target bundleno = 122 (0x7a), region = 132 }
 0x674   : >> { %v1982_v26 = vmul.f32 %v1978_v5, %v1777_v37  ;;  %v1983_v8 = vmul.f32 %v1978_v5, %v1778_v39  ;;  %v1973_v23 = vpop.permute.xlu0 %1972 }
 0x675   : >> { %v1980_v9 = vmul.f32 %v1973_v23, %v3770_v33  ;;  %v1981_v10 = vmul.f32 %v1973_v23, %v3772_v36  ;;  %v2019_v33 = vld [vmem:[%s3935_s10 + $0x8] sm:$0xff] (%p492_p11) }
 0x676   : >> { %v1990_v11 = vadd.f32 %v1982_v26, %v3571_v18  ;;  %v1991_v14 = vadd.f32 %v1983_v8, %v3575_v20  ;;  %v2030_v18 = vpack.c.bf16 (%p492_p11), %v2027_v24, %v2024_v22 }
 0x677   : >> { %v1988_v15 = vadd.f32 %v1980_v9, %v3567_v16  ;;  %v1989_v21 = vadd.f32 %v1981_v10, %v3573_v19  ;;  %v3287_v19 = vmov (%p492_p11), 0   ;;  %v3098_v9 = vld [vmem:[#allocation9 + $0x30] sm:$0xff] (%p492_p11)  }
 0x678   : >> { %1994 = vst [vmem:[#allocation3 + $0x10] sm:$0xff] %v1990_v11  ;;  %1995 = vst [vmem:[#allocation3 + $0x18] sm:$0xff] %v1991_v14  ;;  %2150 = vmatprep.mubr.bf16.mxu0 (%p492_p11), %v3287_v19  ;;  %2088 = vmatprep.mubr.bf16.mxu1 (%p492_p11), %v3287_v19 }
 0x679   : >> { %1992 = vst [vmem:[#allocation3] sm:$0xff] %v1988_v15  ;;  %1993 = vst [vmem:[#allocation3 + $0x8] sm:$0xff] %v1989_v21  ;;  %2104 = vrot.lane.b32.xlu1 (%p492_p11), %v2030_v18, %s3288_s0  ;;  %3090 = vset.pattern.permute.xlu0 (%p492_p11), %v3287_v19 }
 0x67a   : > { %3091 = vset.pattern.permute.xlu1 %v3287_v19 }
 0x67d   : > { %2041 = vrot.lane.b32.xlu1 %v2030_v18, %s3289_s1 }
 0x67f   : > { %v1998_v27 = vld [vmem:[#allocation3 + $0x10] sm:$0xff]  ;;  %v1999_v28 = vld [vmem:[#allocation3 + $0x18] sm:$0xff] }
 0x680   : > { %v1996_v25 = vld [vmem:[#allocation3] sm:$0xff]  ;;  %v1997_v20 = vld [vmem:[#allocation3 + $0x8] sm:$0xff] }
 0x681   : > { %v3801_v16 = vpack.c.bf16 %v1998_v27, %v1996_v25  ;;  %v2032_v29 = vpack.c.bf16 %v1999_v28, %v1997_v20  ;;  %v3099_v25 = vld [vmem:[#allocation9 + $0x38] sm:$0xff]  }
 0x683   : > { %2106 = vrot.lane.b32.xlu0 %v3801_v16, %s3288_s0  ;;  %2043 = vrot.lane.b32.xlu1 %v3801_v16, %s3289_s1 }
 0x687   : > { %2108 = vrot.lane.b32.xlu0 %v2032_v29, %s3288_s0  ;;  %2295 = vrot.lane.b32.xlu1 %v2282_v32, %s3290_s25  ;;  %s2866_s0 = sshll.u32 %s3379_s21, 9  ;;  %s2651_s21 = scalar_lea.sflag [#allocation6], %s3530_s27 }
 0x68b   : > { %2045 = vrot.lane.b32.xlu0 %v2032_v29, %s3289_s1  ;;  %2355 = vrot.lane.b32.xlu1 %v3801_v16, %s3291_s28  ;;  %s2664_s1 = sshll.u32 %s3560_s23, 4  ;;  %s3878_s1 = int_to_ptr.vmem [resolvable:$true] %s2664_s1 }
 0x68f   : > { %2293 = vrot.lane.b32.xlu0 %v2032_v29, %s3290_s25  ;;  %2353 = vrot.lane.b32.xlu1 %v2030_v18, %s3291_s28 }
 0x693   : > { %2291 = vrot.lane.b32.xlu0 %v3801_v16, %s3290_s25  ;;  %2221 = vrot.lane.b32.xlu1 %v2032_v29, %s3292_s22 }
 0x697   : > { %2357 = vrot.lane.b32.xlu0 %v2032_v29, %s3291_s28  ;;  %2417 = vrot.lane.b32.xlu1 %v2032_v29, %s3293_s29 }
 0x69b   : > { %2219 = vrot.lane.b32.xlu0 %v3801_v16, %s3292_s22  ;;  %2415 = vrot.lane.b32.xlu1 %v3801_v16, %s3293_s29 }
 0x69f   : > { %2217 = vrot.lane.b32.xlu0 %v2030_v18, %s3292_s22  ;;  %2485 = vrot.lane.b32.xlu1 %v2282_v32, %s3294_s17  ;;  %v3100_v18 = vld [vmem:[#allocation9 + $0x40] sm:$0xff]  }
 0x6a3   : > { %2419 = vrot.lane.b32.xlu0 %v2282_v32, %s3293_s29  ;;  %2551 = vrot.lane.b32.xlu1 %v2282_v32, %s3295_s14  ;;  %s3975_s29 = sld [smem:[#allocation18_spill]] }
 0x6a7   : > { %2483 = vrot.lane.b32.xlu0 %v2032_v29, %s3294_s17  ;;  %2547 = vrot.lane.b32.xlu1 %v3801_v16, %s3295_s14 }
 0x6ab   : > { %2549 = vrot.lane.b32.xlu0 %v2032_v29, %s3295_s14  ;;  %2631 = vperm.xlu1 %3091, %v2019_v33   ;;  %s3296_s14 = smov [#allocation10]  }
 0x6ac   : > { %s3191_s12 = sshll.u32 %s3296_s14, 4  ;;  %s3192_s12 = int_to_ptr.vmem [resolvable:$false] %s3191_s12 }
 0x6ad   : > { %s3193_s26 = scalar_lea.vmem %s3192_s12, 1024  ;;  %p3194_p9 = scmp.lt.s32.totalorder %s3878_s1, %s3192_s12 }
 0x6af   : > { %2481 = vrot.lane.b32.xlu0 %v3801_v16, %s3294_s17  ;;  %s3875_s17 = scalar_lea.hbm %s3975_s29, %s2866_s0 }
 0x6b3   : > { %2626 = vperm.xlu0 %3090, %v2018_v34  }
 0x6eb   : > { %v2105_v35 = vpop.permute.xlu1 %2104 }
 0x6ef   : > { %v2042_v37 = vpop.permute.xlu1 %2041 }
 0x6f5   : > { %v2107_v36 = vpop.permute.xlu0 %2106  ;;  %v2044_v42 = vpop.permute.xlu1 %2043 }
 0x6f6   : > { %v2111_v40 = vsel %vm615_vm6, %v2105_v35, %v2107_v36  ;;  %v2048_v44 = vsel %vm552_vm5, %v2042_v37, %v2044_v42 }
 0x6f9   : > { %v2109_v38 = vpop.permute.xlu0 %2108  ;;  %v2296_v47 = vpop.permute.xlu1 %2295 }
 0x6fa   : > { %v2112_v39 = vsel %vm615_vm6, %v2107_v36, %v2109_v38 }
 0x6fb   : > { %2118 = vmatprep.subr.bf16.mxu0 %v2112_v39 }
 0x6fc   : > { %2119 = vmatpush1.bf16.msra.mxu0 %v2111_v40 }
 0x6fd   : > { %v2046_v43 = vpop.permute.xlu0 %2045  ;;  %v2356_v50 = vpop.permute.xlu1 %2355 }
 0x6fe   : > { %v2049_v45 = vsel %vm552_vm5, %v2044_v42, %v2046_v43 }
 0x6ff   : > { %2056 = vmatprep.subr.bf16.mxu1 %v2049_v45  ;;  %2843 = vmatmul.mubr.msk.bf16.vlgmr.msra.gmra.mrb[0].mxu0 %vm557_vm4, %v3092_v41 }
 0x700   : > { %2057 = vmatpush1.bf16.msra.mxu1 %v2048_v44  ;;  %2337 = vmatprep.mubr.bf16.mxu0 %v3287_v19 }
 0x701   : > { %v2294_v48 = vpop.permute.xlu0 %2293  ;;  %2169 = vmatprep.subr.bf16.mxu1 %v2032_v29  ;;  %v2354_v55 = vpop.permute.xlu1 %2353 }
 0x702   : > { %v2299_v49 = vsel %vm802_vm7, %v2294_v48, %v2296_v47  ;;  %v2360_v56 = vsel %vm864_vm8, %v2354_v55, %v2356_v50 }
 0x703   : > { %2305 = vmatprep.subr.bf16.mxu0 %v2299_v49  ;;  %2841 = vmatmul.mubr.msk.bf16.vlgmr.msra.gmra.mrb[0].mxu1 %vm557_vm4, %v3093_v46 }
 0x704   : > { %2170 = vmatpush1.bf16.msra.mxu1 %v3801_v16  ;;  %2201 = vmatprep.mubr.bf16.mxu1 %v3287_v19 }
 0x705   : > { %v2292_v51 = vpop.permute.xlu0 %2291  ;;  %v2222_v59 = vpop.permute.xlu1 %2221 }
 0x706   : > { %v2298_v52 = vsel %vm802_vm7, %v2292_v51, %v2294_v48 }
 0x707   : > { %2306 = vmatpush1.bf16.msra.mxu0 %v2298_v52 }
 0x709   : > { %v2358_v57 = vpop.permute.xlu0 %2357  ;;  %v2418_v62 = vpop.permute.xlu1 %2417 }
 0x70a   : > { %v2361_v58 = vsel %vm864_vm8, %v2356_v50, %v2358_v57  ;;  %2849 = vmatmul.mubr.msk.bf16.vlgmr.msra.gmra.mrb[4].mxu0 %vm557_vm4, %v3094_v53 }
 0x70b   : > { %2367 = vmatprep.subr.bf16.mxu0 %v2361_v58  ;;  %2845 = vmatmul.mubr.msk.bf16.vlgmr.msra.gmra.mrb[4].mxu1 %vm557_vm4, %v3095_v54 }
 0x70c   : > { %2368 = vmatpush1.bf16.msra.mxu0 %v2360_v56  ;;  %2399 = vmatprep.mubr.bf16.mxu0 %v3287_v19 }
 0x70d   : > { %v2220_v60 = vpop.permute.xlu0 %2219  ;;  %2263 = vmatprep.mubr.bf16.mxu1 %v3287_v19  ;;  %v2416_v2 = vpop.permute.xlu1 %2415 }
 0x70e   : > { %v2225_v61 = vsel %vm557_vm4, %v2220_v60, %v2222_v59  ;;  %v2422_v3 = vsel %vm926_vm9, %v2416_v2, %v2418_v62  ;;  %v2639_v59 = vld [vmem:[%s3536_s30 + $0x8] sm:$0xff] }
 0x70f   : > { %2231 = vmatprep.subr.bf16.mxu1 %v2225_v61 }
 0x711   : > { %v2218_v63 = vpop.permute.xlu0 %2217  ;;  %v2486_v26 = vpop.permute.xlu1 %2485 }
 0x712   : > { %v2224_v0 = vsel %vm557_vm4, %v2218_v63, %v2220_v60 }
 0x713   : > { %2232 = vmatpush1.bf16.msra.mxu1 %v2224_v0 }
 0x715   : > { %v2420_v4 = vpop.permute.xlu0 %2419  ;;  %v2552_v10 = vpop.permute.xlu1 %2551 }
 0x716   : > { %v2423_v5 = vsel %vm926_vm9, %v2418_v62, %v2420_v4  ;;  %2851 = vmatmul.mubr.msk.bf16.vlgmr.msra.gmra.mrb[4].mxu0 %vm557_vm4, %v3096_v17  ;;  %v2641_v17 = vld [vmem:[%s3536_s30 + $0x18] sm:$0xff] }
 0x717   : > { %2429 = vmatprep.subr.bf16.mxu0 %v2423_v5  ;;  %2847 = vmatmul.mubr.msk.bf16.vlgmr.msra.gmra.mrb[4].mxu1 %vm557_vm4, %v3097_v1 }
 0x718   : > { %2430 = vmatpush1.bf16.msra.mxu0 %v2422_v3  ;;  %2461 = vmatprep.mubr.bf16.mxu0 %v3287_v19 }
 0x719   : > { %v2484_v8 = vpop.permute.xlu0 %2483  ;;  %2527 = vmatprep.mubr.bf16.mxu1 %v3287_v19  ;;  %v2548_v15 = vpop.permute.xlu1 %2547 }
 0x71a   : > { %v2489_v23 = vsel %vm992_vm10, %v2484_v8, %v2486_v26 }
 0x71b   : > { %2495 = vmatprep.subr.bf16.mxu1 %v2489_v23 }
 0x71d   : > { %v2550_v11 = vpop.permute.xlu0 %2549 }
 0x71e   : > { %2853 = vmatmul.mubr.msk.bf16.vlgmr.msra.gmra.mrb[0].mxu0 %vm557_vm4, %v3098_v9  ;;  %v2555_v14 = vsel %vm1058_vm11, %v2550_v11, %v2552_v10  ;;  %v2554_v21 = vsel %vm1058_vm11, %v2548_v15, %v2550_v11 }
 0x71f   : > { %2561 = vmatprep.subr.bf16.mxu0 %v2555_v14  ;;  %2593 = vmatprep.mubr.bf16.mxu0 %v3287_v19 }
 0x720   : > { %2562 = vmatpush1.bf16.msra.mxu0 %v2554_v21 }
 0x721   : > { %v2482_v22 = vpop.permute.xlu0 %2481 }
 0x722   : > { %v2488_v24 = vsel %vm992_vm10, %v2482_v22, %v2484_v8 }
 0x723   : > { %2496 = vmatpush1.bf16.msra.mxu1 %v2488_v24 }
 0x726   : > { %2855 = vmatmul.mubr.msk.bf16.vlgmr.msra.gmra.mrb[4].mxu1 %vm557_vm4, %v3099_v25  ;;  %2857 = vmatmul.mubr.msk.bf16.vlgmr.msra.gmra.mrb[4].mxu0 %vm557_vm4, %v3100_v18 }
 0x72a   : > { %v2632_v58 = vpop.permute.xlu1 %2631 }
 0x732   : > { %v2627_v37 = vpop.permute.xlu0 %2626 }
 0x7d6   : > { %v2090_v27 = vpop.f32.mrb[0].mxu1 }
 0x7d7   : > { %v2092_v20 = vpop.f32.mrb[1].mxu1 }
 0x7d8   : > { %v2094_v28 = vpop.f32.mrb[2].mxu1 }
 0x7d9   : > { %v2096_v16 = vpop.f32.mrb[3].mxu1 }
 0x7f1   : > { %v2463_v29 = vpop.f32.mrb[0].mxu0 }
 0x7f2   : > { %v2936_v19 = vadd.f32 %v2463_v29, %v2090_v27  ;;  %v2465_v30 = vpop.f32.mrb[1].mxu0 }
 0x7f3   : > { %v2937_v31 = vadd.f32 %v2465_v30, %v2092_v20  ;;  %v2467_v32 = vpop.f32.mrb[2].mxu0 }
 0x7f4   : > { %v2938_v33 = vadd.f32 %v2467_v32, %v2094_v28  ;;  %v2469_v34 = vpop.f32.mrb[3].mxu0  ;;  %v2608_v36 = vmul.f32 %v2936_v19, %v3546_v6 }
 0x7f5   : > { %v2939_v35 = vadd.f32 %v2469_v34, %v2096_v16  ;;  %v2609_v38 = vmul.f32 %v2937_v31, %v3554_v12 }
 0x7f6   : > { %v2610_v41 = vmul.f32 %v2938_v33, %v3546_v6 }
 0x7f7   : > { %v2611_v46 = vmul.f32 %v2939_v35, %v3554_v12  ;;  %v2638_v12 = vld [vmem:[%s3536_s30] sm:$0xff] }
 0x7f9   : > { %v2529_v39 = vpop.f32.mrb[4].mxu1  ;;  %v2595_v40 = vpop.f32.mrb[4].mxu0 }
 0x7fa   : > { %v2612_v42 = vadd.f32 %v2608_v36, %v2529_v39  ;;  %v2616_v43 = vmul.f32 %v3548_v7, %v2595_v40  ;;  %v2531_v44 = vpop.f32.mrb[5].mxu1  ;;  %v2597_v45 = vpop.f32.mrb[5].mxu0 }
 0x7fb   : > { %v2613_v47 = vadd.f32 %v2609_v38, %v2531_v44  ;;  %v2617_v48 = vmul.f32 %v3556_v13, %v2597_v45  ;;  %v2533_v49 = vpop.f32.mrb[6].mxu1  ;;  %v2599_v50 = vpop.f32.mrb[6].mxu0 }
 0x7fc   : > { %v2614_v51 = vadd.f32 %v2610_v41, %v2533_v49  ;;  %v2618_v52 = vmul.f32 %v3548_v7, %v2599_v50  ;;  %v2535_v6 = vpop.f32.mrb[7].mxu1  ;;  %v2601_v53 = vpop.f32.mrb[7].mxu0  ;;  %v2620_v54 = vadd.f32 %v2616_v43, %v2612_v42  ;;  %v2640_v7 = vld [vmem:[%s3536_s30 + $0x10] sm:$0xff]  ;;  %s3187_s30 = scalar_lea.vmem %s3878_s1, 512 }
 0x7fd   : > { %v2615_v55 = vadd.f32 %v2611_v46, %v2535_v6  ;;  %v2619_v56 = vmul.f32 %v3556_v13, %v2601_v53  ;;  %v2621_v57 = vadd.f32 %v2617_v48, %v2613_v47  ;;  %p3188_p0 = scmp.ne.s32.totalorder %s3878_s1, %s3187_s30  ;;  %p3195_p12 = scmp.lt.s32.totalorder %s3193_s26, %s3187_s30 }
 0x7fe   : > { %v2634_v60 = vadd.f32 %v2627_v37, %v2620_v54  ;;  %v2622_v61 = vadd.f32 %v2618_v52, %v2614_v51 }
 0x7ff   : > { %v2623_v62 = vadd.f32 %v2619_v56, %v2615_v55  ;;  %v2635_v63 = vadd.f32 %v2627_v37, %v2621_v57  ;;  %p3189_p3 = pnand %p3188_p0, %p3976_p1  ;;  %p3196_p2 = por %p3195_p12, %p3194_p9 }
 0x800   : > { %v2642_v0 = vadd.f32 %v2638_v12, %v2634_v60  ;;  %v2636_v1 = vadd.f32 %v2632_v58, %v2622_v61 }
 0x801   : > { %v2643_v13 = vadd.f32 %v2639_v59, %v2635_v63  ;;  %v2637_v2 = vadd.f32 %v2632_v58, %v2623_v62  ;;  %p3190_p7 = pneg %p3189_p3 }
 0x802   : > { %2646 = vst [vmem:[%s3560_s23] sm:$0xff] %v2642_v0  ;;  %v2644_v3 = vadd.f32 %v2640_v7, %v2636_v1 }
 0x803   : > { %2647 = vst [vmem:[%s3560_s23 + $0x8] sm:$0xff] %v2643_v13  ;;  %v2645_v4 = vadd.f32 %v2641_v17, %v2637_v2  ;;  %p3197_p13 = pnand %p3196_p2, %p3190_p7 }
 0x804   : > { %2648 = vst [vmem:[%s3560_s23 + $0x10] sm:$0xff] %v2644_v3 }
 0x805   : > { %2649 = vst [vmem:[%s3560_s23 + $0x18] sm:$0xff] %v2645_v4 }
 0x806   : > { %3200 = shalt.err (!%p3197_p13)
}
 0x807   : > { %s3201_s23 = scalar_lea.hbm %s3875_s17, 512  ;;  %s3205_s0 = scalar_lea.hbm %s3975_s29, 1024 }
 0x808   : > { %p3202_p6 = scmp.ne.s32.totalorder %s3875_s17, %s3201_s23  ;;  %p3206_p5 = scmp.lt.u32.totalorder %s3875_s17, %s3975_s29 }
 0x809   : > { %p3207_p8 = scmp.lt.u32.totalorder %s3205_s0, %s3201_s23  ;;  %p3209_p0 = scmp.lt.u32.totalorder %s3201_s23, %s3875_s17 }
 0x80a   : > { %p3203_p10 = pnand %p3202_p6, %p3976_p1 }
 0x80b   : > { %p3208_p11 = por %p3207_p8, %p3206_p5 }
 0x80c   : > { %p3204_p4 = pneg %p3203_p10 }
 0x80d   : > { %p3210_p3 = por %p3209_p0, %p3208_p11 }
 0x80f   : > { %p3211_p7 = pnand %p3210_p3, %p3204_p4 }
 0x811   : > { %3214 = shalt.err (!%p3211_p7)
}
 0x812   : > { %s3297_s30 = smov 256  }
 0x813   : > { %2970 = dma.vmem_to_hbm [thread:$0]  (%p3976_p1), %s3878_s1, 512, %s3875_s17, %s2651_s21, %s3297_s30, %s3297_s30, %s3292_s22  }
 0x814 PF: > { %s3977_s14 = sld [smem:[#allocation14_spill]]  ;;  %s3978_s12 = sld [smem:[#allocation15_spill]] }
 0x815   : > { %p3980_p12 = scmp.ge.s32.totalorder %s3261_s20, 2 }
 0x81a   : > { %s2679_s26 = sand.u32 1, %s3977_s14   ;;  %p3979_p9 = scmp.ne.s32.totalorder %s3978_s12, 0 }
 0x81b   : > { %s2680_s23 = scalar_lea.sflag [#allocation6], %s2679_s26 }
 0x81c   : > { %p2984_p2 = pnand %p3980_p12, %p3979_p9 }
 0x81e   : > { %3244 = dma.done.wait (!%p2984_p2), %s2680_s23, 512  }
 0x81f   : > { %3246 = vsyncadd (!%p2984_p2), %s2680_s23, 4294966784  ;;  %p25_p13 = scmp.ge.s32.totalorder %s3468_s24, 4   ;;  %s3981_s17 = smov %s3253_s18 }
 0x820   : > { %s3982_s18 = smov %s3257_s19  ;;  %s3983_s19 = smov %s3484_s16 }
 0x821   : > { %s3984_s20 = smov %s3468_s24  ;;  %27 = sbr.rel (!%p25_p13) target bundleno = 10 (0xa), region = 143 }
 0x828   :  { %2685 = vsyncpa [#allocation5], 1 }
 0x829   :  { %2687 = vsyncpa [#allocation5 + $0x1], 1 }
 0x82a   :  { %2688 = vsyncpa [#allocation8], 1 }
 0x82b   :  { %2689 = vsyncpa [#allocation6], 1 }
 0x82c   :  { %2691 = vsyncpa [#allocation6 + $0x1], 1 }

</bundles_post_ra>
